<compile_context>
chip_gen: v6e
topology: v6e:2x2x1
jax: 0.10.0
libtpu: 0.0.40
codegen_flags: <defaults>
</compile_context>

<pallas_src>
from functools import partial

import jax
import jax.numpy as jnp
from jax.experimental import pallas as pl
from jax.experimental.pallas import tpu as pltpu

LN_EPS = 1e-5

# Row layout of the packed per-gate vector-parameter block: (N_VEC_ROWS, Hp).
ROW_LN1_G, ROW_LN1_B, ROW_L1A_B, ROW_L1B_B = 0, 1, 2, 3
ROW_LN2_G, ROW_LN2_B, ROW_L2A_B, ROW_L2B_B = 4, 5, 6, 7
ROW_W1, ROW_W2, ROW_LNG, ROW_LNB = 8, 9, 10, 11
N_VEC_ROWS = 12


# ----------------------------- small helpers --------------------------------
def _round_up(x, m):
    return ((x + m - 1) // m) * m


def _pad_last(a, target):
    pad = target - a.shape[-1]
    if pad == 0:
        return a
    cfg = [(0, 0)] * (a.ndim - 1) + [(0, pad)]
    return jnp.pad(a, cfg)


def _prep_stream(x, hp, stream_dtype):
    """Pad hidden axis to hp.  If a pad copy is needed anyway, fold the cast to
    the narrow stream dtype into it; otherwise pass through with no copy."""
    x = jnp.asarray(x)
    if x.shape[-1] == hp:
        return x
    return _pad_last(x, hp).astype(stream_dtype)


def _vmem_limit_bytes():
    """3/4 of physical VMEM: ~96 MiB on v5e/v6e (128 MiB), ~48 MiB on v7x (64 MiB)."""
    try:
        cap = int(pltpu.get_tpu_info().vmem_capacity_bytes)
    except Exception:
        cap = 64 << 20
    return (cap * 3) // 4


def _pick_seq_tile(S, B, hp, hrp, *, n_gates, n_in, in_itemsize, out_itemsize,
                   vmem_limit):
    """Largest sequence tile fitting an explicit VMEM budget."""
    # Resident, double-buffered parameter blocks (packed vectors + bf16 weights).
    fixed = 2 * n_gates * (N_VEC_ROWS * hp * 4 + 8 * hp * hrp)
    # Per sequence-row: double-buffered activation streams + generous allowance
    # for the f32 intermediates live inside the kernel body.
    per_row = (2 * (n_in * in_itemsize + out_itemsize) * hp
               + 12 * 4 * hp + 2 * 4 * hrp)
    budget = vmem_limit - fixed - (4 << 20)          # safety margin
    rows = max(8, budget // per_row)
    ts = min(S, int(rows))
    if ts >= 256:
        ts = (ts // 256) * 256                       # fill the 256-row MXU (v6e/v7x)
    elif ts >= 8:
        ts = (ts // 8) * 8
    else:
        ts = S                                       # S < 8: block == full dim
    ts = max(1, min(ts, S))
    # v7x has 2 TensorCores: make sure the parallel grid has >= 2 steps.
    if B * pl.cdiv(S, ts) < 2 and S >= 16:
        ts = max(8, (((S + 1) // 2) // 8) * 8)
    return ts


# ------------------------------ kernel math ----------------------------------
def _lane_mask(hp, h):
    lane = jax.lax.broadcasted_iota(jnp.int32, (1, hp), 1)
    return (lane < h).astype(jnp.float32)


def _layer_norm(x, gamma, beta, mask, inv_h):
    """Masked two-pass LayerNorm over the lane axis; padded lanes stay exactly 0."""
    mu = jnp.sum(x * mask, axis=-1, keepdims=True) * inv_h
    xc = (x - mu) * mask
    var = jnp.sum(xc * xc, axis=-1, keepdims=True) * inv_h
    return xc * jax.lax.rsqrt(var + LN_EPS) * gamma + beta


def _gate_math(x1, x2, g, dis, b1, vec_ref, wa_ref, wb_ref, mask, inv_h, hrp):
    """One Gate.forward on f32 tiles x1, x2 of shape (TS, Hp) for gate index g."""

    def vrow(i, w=None):
        return vec_ref[g, i:i + 1, :] if w is None else vec_ref[g, i:i + 1, :w]

    def adapter(x, base, idx):
        xn = _layer_norm(x, vrow(base + 0), vrow(base + 1), mask, inv_h)
        wa = wa_ref[g, idx]                                    # (Hp, Hrp) bf16
        h = jnp.dot(xn.astype(wa.dtype), wa,
                    preferred_element_type=jnp.float32) + vrow(base + 2, hrp)
        h = jnp.maximum(h, 0.0)        # ReLU; Dropout(p=0.5) is identity in eval mode
        wb = wb_ref[g, idx]                                    # (Hrp, Hp) bf16
        return jnp.dot(h.astype(wb.dtype), wb,
                       preferred_element_type=jnp.float32) + vrow(base + 3)

    y1 = adapter(x1, 0, 0)                                     # fc1(x1)
    y2 = adapter(x2, 4, 1)                                     # fc2(x2)

    # gating: the two (TS,H)@(H,1) matmuls become a VPU multiply + lane reduce.
    s1 = jnp.sum(y1 * vrow(ROW_W1), axis=-1, keepdims=True)
    s2 = jnp.sum(y2 * vrow(ROW_W2), axis=-1, keepdims=True)
    alpha = jax.nn.sigmoid(s1 + s2 + b1)
    alpha = jnp.clip(alpha * dis, 0.15, 0.85)

    z = y1 * alpha + (1.0 - alpha) * y2
    return _layer_norm(z, vrow(ROW_LNG), vrow(ROW_LNB), mask, inv_h)


def _trigate_fused_kernel(dis_ref, tp_ref, ip_ref, mm_ref,
                          vec_ref, wa_ref, wb_ref, o_ref, *, h, hrp):
    """text_gate + image_gate + mm_gate fused on one (batch, seq) tile."""
    b = pl.program_id(0)
    nb = pl.num_programs(0)
    hp = vec_ref.shape[-1]
    mask = _lane_mask(hp, h)
    inv_h = 1.0 / h

    xt = tp_ref[0].astype(jnp.float32)                         # (TS, Hp)
    xi = ip_ref[0].astype(jnp.float32)
    xm = mm_ref[0].astype(jnp.float32)

    args = (vec_ref, wa_ref, wb_ref, mask, inv_h, hrp)
    tm = _gate_math(xt, xm, 0, dis_ref[b],      dis_ref[2 * nb + 0], *args)
    im = _gate_math(xi, xm, 1, dis_ref[nb + b], dis_ref[2 * nb + 1], *args)
    out = _gate_math(tm, im, 2, 1.0,            dis_ref[2 * nb + 2], *args)
    o_ref[0] = out.astype(o_ref.dtype)


def _single_gate_kernel(dis_ref, x1_ref, x2_ref,
                        vec_ref, wa_ref, wb_ref, o_ref, *, h, hrp):
    """One Gate.forward on one (batch, seq) tile (fallback triGate paths)."""
    b = pl.program_id(0)
    nb = pl.num_programs(0)
    hp = vec_ref.shape[-1]
    mask = _lane_mask(hp, h)
    inv_h = 1.0 / h

    x1 = x1_ref[0].astype(jnp.float32)
    x2 = x2_ref[0].astype(jnp.float32)
    out = _gate_math(x1, x2, 0, dis_ref[b], dis_ref[nb],
                     vec_ref, wa_ref, wb_ref, mask, inv_h, hrp)
    o_ref[0] = out.astype(o_ref.dtype)


# ------------------------- parameter packing (wrapper) ----------------------
def _pack_gate_vectors(p, hp):
    def row(v):
        return _pad_last(jnp.asarray(v, jnp.float32).reshape(1, -1), hp)
    return jnp.concatenate([
        row(p["ln1_g"]), row(p["ln1_b"]), row(p["l1a_b"]), row(p["l1b_b"]),
        row(p["ln2_g"]), row(p["ln2_b"]), row(p["l2a_b"]), row(p["l2b_b"]),
        row(p["w1"]), row(p["w2"]), row(p["lng"]), row(p["lnb"]),
    ], axis=0)                                                 # (12, Hp) f32


def _pack_gate_mats(p, hp, hrp, dtype):
    def mat(w, rows, cols):
        w = jnp.asarray(w, jnp.float32)
        w = jnp.pad(w, ((0, rows - w.shape[0]), (0, cols - w.shape[1])))
        return w.astype(dtype)
    wa = jnp.stack([mat(p["l1a_w"], hp, hrp), mat(p["l2a_w"], hp, hrp)], axis=0)
    wb = jnp.stack([mat(p["l1b_w"], hrp, hp), mat(p["l2b_w"], hrp, hp)], axis=0)
    return wa, wb                                              # (2,Hp,Hrp), (2,Hrp,Hp)


# ------------------------------- public calls --------------------------------
def gate_forward(x1, x2, params, dis=None, *, matmul_dtype=jnp.bfloat16,
                 stream_dtype=jnp.bfloat16):
    """Single Gate.forward (eval mode) as one pallas_call."""
    B, S, H = x1.shape
    Hr = params["l1a_w"].shape[1]
    Hp = _round_up(H, 128)
    Hrp = _round_up(Hr, 128)

    x1p = _prep_stream(x1, Hp, stream_dtype)
    x2p = _prep_stream(x2, Hp, stream_dtype)

    vec = _pack_gate_vectors(params, Hp)[None]                 # (1, 12, Hp)
    wa, wb = _pack_gate_mats(params, Hp, Hrp, matmul_dtype)
    wa, wb = wa[None], wb[None]                                # (1,2,Hp,Hrp) / (1,2,Hrp,Hp)

    dis_v = (jnp.ones((B,), jnp.float32) if dis is None
             else jnp.asarray(dis, jnp.float32).reshape(B))
    b1 = jnp.asarray(params["b1"], jnp.float32).reshape(1)
    dis_flat = jnp.concatenate([dis_v, b1])                    # (B+1,) -> SMEM

    vmem_limit = _vmem_limit_bytes()
    TS = _pick_seq_tile(S, B, Hp, Hrp, n_gates=1, n_in=2,
                        in_itemsize=x1p.dtype.itemsize, out_itemsize=4,
                        vmem_limit=vmem_limit)
    ns = pl.cdiv(S, TS)

    out = pl.pallas_call(
        partial(_single_gate_kernel, h=H, hrp=Hrp),
        out_shape=jax.ShapeDtypeStruct((B, S, Hp), jnp.float32),
        grid_spec=pltpu.PrefetchScalarGridSpec(
            num_scalar_prefetch=1,
            grid=(B, ns),
            in_specs=[
                pl.BlockSpec((1, TS, Hp), lambda b, s, *_: (b, s, 0)),
                pl.BlockSpec((1, TS, Hp), lambda b, s, *_: (b, s, 0)),
                pl.BlockSpec((1, N_VEC_ROWS, Hp), lambda b, s, *_: (0, 0, 0)),
                pl.BlockSpec((1, 2, Hp, Hrp), lambda b, s, *_: (0, 0, 0, 0)),
                pl.BlockSpec((1, 2, Hrp, Hp), lambda b, s, *_: (0, 0, 0, 0)),
            ],
            out_specs=pl.BlockSpec((1, TS, Hp), lambda b, s, *_: (b, s, 0)),
        ),
        compiler_params=pltpu.CompilerParams(
            dimension_semantics=("parallel", "parallel"),
            vmem_limit_bytes=vmem_limit),
    )(dis_flat, x1p, x2p, vec, wa, wb)
    return out if H == Hp else out[..., :H]


def trigate_forward(params, text_prompt, image_prompt, mm_memory=None,
                    text_sim=None, image_sim=None, two_gate=False, *,
                    matmul_dtype=jnp.bfloat16, stream_dtype=jnp.bfloat16):
    """Pallas implementation of triGate.forward (eval mode)."""
    if two_gate:
        if mm_memory is None:
            raise ValueError("two_gate=True requires mm_memory (mirrors the reference).")
        tm = gate_forward(text_prompt, image_prompt, params["text_gate"], text_sim,
                          matmul_dtype=matmul_dtype, stream_dtype=stream_dtype)
        return gate_forward(tm, mm_memory, params["mm_gate"], None,
                            matmul_dtype=matmul_dtype, stream_dtype=stream_dtype)
    if mm_memory is None:
        return gate_forward(text_prompt, image_prompt, params["mm_gate"], None,
                            matmul_dtype=matmul_dtype, stream_dtype=stream_dtype)

    # Default path: text_gate + image_gate + mm_gate fully fused in ONE pallas_call.
    # (The reference calls image_gate twice with identical args; computed once.)
    B, S, H = text_prompt.shape
    Hr = params["mm_gate"]["l1a_w"].shape[1]
    Hp = _round_up(H, 128)
    Hrp = _round_up(Hr, 128)

    tp = _prep_stream(text_prompt, Hp, stream_dtype)
    ip = _prep_stream(image_prompt, Hp, stream_dtype)
    mm = _prep_stream(mm_memory, Hp, stream_dtype)

    gates = (params["text_gate"], params["image_gate"], params["mm_gate"])
    vec = jnp.stack([_pack_gate_vectors(p, Hp) for p in gates], axis=0)  # (3,12,Hp)
    mats = [_pack_gate_mats(p, Hp, Hrp, matmul_dtype) for p in gates]
    wa = jnp.stack([m[0] for m in mats], axis=0)               # (3,2,Hp,Hrp) bf16
    wb = jnp.stack([m[1] for m in mats], axis=0)               # (3,2,Hrp,Hp) bf16

    ones = jnp.ones((B,), jnp.float32)
    tsim = ones if text_sim is None else jnp.asarray(text_sim, jnp.float32).reshape(B)
    isim = ones if image_sim is None else jnp.asarray(image_sim, jnp.float32).reshape(B)
    b1s = jnp.stack([jnp.asarray(p["b1"], jnp.float32).reshape(()) for p in gates])
    dis_flat = jnp.concatenate([tsim, isim, b1s])              # (2B+3,) -> SMEM

    vmem_limit = _vmem_limit_bytes()
    TS = _pick_seq_tile(S, B, Hp, Hrp, n_gates=3, n_in=3,
                        in_itemsize=tp.dtype.itemsize, out_itemsize=4,
                        vmem_limit=vmem_limit)
    ns = pl.cdiv(S, TS)

    out = pl.pallas_call(
        partial(_trigate_fused_kernel, h=H, hrp=Hrp),
        out_shape=jax.ShapeDtypeStruct((B, S, Hp), jnp.float32),
        grid_spec=pltpu.PrefetchScalarGridSpec(
            num_scalar_prefetch=1,
            grid=(B, ns),
            in_specs=[
                pl.BlockSpec((1, TS, Hp), lambda b, s, *_: (b, s, 0)),
                pl.BlockSpec((1, TS, Hp), lambda b, s, *_: (b, s, 0)),
                pl.BlockSpec((1, TS, Hp), lambda b, s, *_: (b, s, 0)),
                pl.BlockSpec((3, N_VEC_ROWS, Hp), lambda b, s, *_: (0, 0, 0)),
                pl.BlockSpec((3, 2, Hp, Hrp), lambda b, s, *_: (0, 0, 0, 0)),
                pl.BlockSpec((3, 2, Hrp, Hp), lambda b, s, *_: (0, 0, 0, 0)),
            ],
            out_specs=pl.BlockSpec((1, TS, Hp), lambda b, s, *_: (b, s, 0)),
        ),
        compiler_params=pltpu.CompilerParams(
            dimension_semantics=("parallel", "parallel"),
            vmem_limit_bytes=vmem_limit),
    )(dis_flat, tp, ip, mm, vec, wa, wb)
    return out if H == Hp else out[..., :H]


# ---------------- parameter construction (deterministic, synthetic) ----------
def make_gate_params(key, H, hidden_dim):
    Hr = H // hidden_dim
    keys = jax.random.split(key, 7)

    def linear(k, din, dout):
        kw, kb = jax.random.split(k)
        bound = 1.0 / jnp.sqrt(float(din))
        w = jax.random.uniform(kw, (din, dout), jnp.float32, -bound, bound)
        b = jax.random.uniform(kb, (1, dout), jnp.float32, -bound, bound)
        return w, b

    l1a_w, l1a_b = linear(keys[0], H, Hr)
    l1b_w, l1b_b = linear(keys[1], Hr, H)
    l2a_w, l2a_b = linear(keys[2], H, Hr)
    l2b_w, l2b_b = linear(keys[3], Hr, H)
    w1 = jax.random.normal(keys[4], (1, H), jnp.float32) * jnp.sqrt(2.0 / H)
    w2 = jax.random.normal(keys[5], (1, H), jnp.float32) * jnp.sqrt(2.0 / H)
    b1 = jax.random.normal(keys[6], (1, 1), jnp.float32) * jnp.sqrt(2.0)
    return dict(
        ln1_g=jnp.ones((1, H), jnp.float32), ln1_b=jnp.zeros((1, H), jnp.float32),
        l1a_w=l1a_w, l1a_b=l1a_b, l1b_w=l1b_w, l1b_b=l1b_b,
        ln2_g=jnp.ones((1, H), jnp.float32), ln2_b=jnp.zeros((1, H), jnp.float32),
        l2a_w=l2a_w, l2a_b=l2a_b, l2b_w=l2b_w, l2b_b=l2b_b,
        w1=w1, w2=w2, b1=b1,
        lng=jnp.ones((1, H), jnp.float32), lnb=jnp.zeros((1, H), jnp.float32),
    )


def make_trigate_params(key, H, hidden_dim):
    k1, k2, k3 = jax.random.split(key, 3)
    return {"text_gate": make_gate_params(k1, H, hidden_dim),
            "image_gate": make_gate_params(k2, H, hidden_dim),
            "mm_gate": make_gate_params(k3, H, hidden_dim)}


# ---------------- pure-JAX reference (matched precision) ---------------------
def _layernorm_ref(x, g, b):
    mu = jnp.mean(x, axis=-1, keepdims=True)
    var = jnp.mean((x - mu) ** 2, axis=-1, keepdims=True)
    return (x - mu) * jax.lax.rsqrt(var + LN_EPS) * g + b


def gate_ref(x1, x2, p, dis=None, matmul_dtype=jnp.bfloat16):
    def adapter(x, g, b, wa, ba, wb, bb):
        xn = _layernorm_ref(x, g, b)
        h = jnp.maximum(jnp.dot(xn.astype(matmul_dtype), wa.astype(matmul_dtype),
                                preferred_element_type=jnp.float32) + ba, 0.0)
        return jnp.dot(h.astype(matmul_dtype), wb.astype(matmul_dtype),
                       preferred_element_type=jnp.float32) + bb

    y1 = adapter(x1, p["ln1_g"], p["ln1_b"], p["l1a_w"], p["l1a_b"], p["l1b_w"], p["l1b_b"])
    y2 = adapter(x2, p["ln2_g"], p["ln2_b"], p["l2a_w"], p["l2a_b"], p["l2b_w"], p["l2b_b"])
    s1 = jnp.sum(y1 * p["w1"].reshape(1, 1, -1), axis=-1, keepdims=True)
    s2 = jnp.sum(y2 * p["w2"].reshape(1, 1, -1), axis=-1, keepdims=True)
    alpha = jax.nn.sigmoid(s1 + s2 + p["b1"].reshape(()))
    if dis is not None:
        alpha = dis[:, None, None] * alpha
    alpha = jnp.clip(alpha, 0.15, 0.85)
    return _layernorm_ref(y1 * alpha + (1.0 - alpha) * y2, p["lng"], p["lnb"])


def trigate_ref(params, t, i, mm=None, tsim=None, isim=None, two_gate=False,
                matmul_dtype=jnp.bfloat16):
    if two_gate:
        tm = gate_ref(t, i, params["text_gate"], tsim, matmul_dtype)
        im = mm
    elif mm is not None:
        tm = gate_ref(t, mm, params["text_gate"], tsim, matmul_dtype)
        im = gate_ref(i, mm, params["image_gate"], isim, matmul_dtype)
    else:
        tm, im = t, i
    return gate_ref(tm, im, params["mm_gate"], None, matmul_dtype)


if __name__ == "__main__":
    B, S, H, hidden_dim = 2, 8, 32, 4   # hidden_size=32, mlp hidden divisor=4
    key = jax.random.PRNGKey(0)
    kp, kt, ki, km, ks1, ks2 = jax.random.split(key, 6)

    params = make_trigate_params(kp, H, hidden_dim)
    text_prompt = jax.random.normal(kt, (B, S, H), jnp.float32)
    image_prompt = jax.random.normal(ki, (B, S, H), jnp.float32)
    mm_memory = jax.random.normal(km, (B, S, H), jnp.float32)
    text_sim = jax.random.uniform(ks1, (B,), jnp.float32, 0.5, 1.5)
    image_sim = jax.random.uniform(ks2, (B,), jnp.float32, 0.5, 1.5)

    # main (fully fused) path
    out = trigate_forward(params, text_prompt, image_prompt, mm_memory=mm_memory,
                          text_sim=text_sim, image_sim=image_sim, two_gate=False)
    out = jax.block_until_ready(out)
    assert out.shape == (B, S, H)

    # matched-precision reference: external inputs get the same bf16 stream cast.
    q = lambda a: a.astype(jnp.bfloat16).astype(jnp.float32)
    ref = trigate_ref(params, q(text_prompt), q(image_prompt), q(mm_memory),
                      text_sim, image_sim, two_gate=False)
    assert jnp.allclose(out, ref, atol=2e-3, rtol=2e-3), \
        float(jnp.max(jnp.abs(out - ref)))

    # also exercise the single-gate kernel used by the fallback paths
    g_out = jax.block_until_ready(
        gate_forward(text_prompt, image_prompt, params["text_gate"], text_sim))
    g_ref = gate_ref(q(text_prompt), q(image_prompt), params["text_gate"], text_sim)
    assert g_out.shape == (B, S, H)
    assert jnp.allclose(g_out, g_ref, atol=2e-3, rtol=2e-3), \
        float(jnp.max(jnp.abs(g_out - g_ref)))

    print("KERNEL_OK")
</pallas_src>

<mosaic_0001>
module attributes {stable_mosaic.version = 11 : i64} {
  func.func @_trigate_fused_kernel(%arg0: i32, %arg1: i32, %arg2: memref<7xf32, #tpu.memory_space<smem>>, %arg3: memref<1x8x128xbf16, #tpu.memory_space<vmem>>, %arg4: memref<1x8x128xbf16, #tpu.memory_space<vmem>>, %arg5: memref<1x8x128xbf16, #tpu.memory_space<vmem>>, %arg6: memref<3x12x128xf32, #tpu.memory_space<vmem>>, %arg7: memref<3x2x128x128xbf16, #tpu.memory_space<vmem>>, %arg8: memref<3x2x128x128xbf16, #tpu.memory_space<vmem>>, %arg9: memref<1x8x128xf32, #tpu.memory_space<vmem>>) attributes {dimension_semantics = [#tpu.dimension_semantics<parallel>, #tpu.dimension_semantics<parallel>], iteration_bounds = array<i64: 2, 1>, scalar_prefetch = 1 : i64, scratch_operands = 0 : i64, tpu.core_type = #tpu.core_type<tc>, window_params = [{transform_indices = @transform_0, window_bounds = array<i64: 1, 8, 128>}, {transform_indices = @transform_1, window_bounds = array<i64: 1, 8, 128>}, {transform_indices = @transform_2, window_bounds = array<i64: 1, 8, 128>}, {pipeline_mode = #tpu.pipeline_mode<synchronous>, transform_indices = @transform_3, window_bounds = array<i64: 3, 12, 128>}, {pipeline_mode = #tpu.pipeline_mode<synchronous>, transform_indices = @transform_4, window_bounds = array<i64: 3, 2, 128, 128>}, {pipeline_mode = #tpu.pipeline_mode<synchronous>, transform_indices = @transform_5, window_bounds = array<i64: 3, 2, 128, 128>}, {transform_indices = @transform_6, window_bounds = array<i64: 1, 8, 128>}]} {
    %0 = tpu.iota {dimensions = array<i32: 1>} : vector<1x128xi32>
    %c32_i32 = arith.constant 32 : i32
    %1 = vector.broadcast %c32_i32 : i32 to vector<1x128xi32>
    %2 = arith.cmpi slt, %0, %1 : vector<1x128xi32>
    %3 = arith.extui %2 : vector<1x128xi1> to vector<1x128xi32>
    %4 = arith.sitofp %3 : vector<1x128xi32> to vector<1x128xf32>
    %c0 = arith.constant 0 : index
    %c0_0 = arith.constant 0 : index
    %c0_1 = arith.constant 0 : index
    %5 = vector.load %arg3[%c0, %c0_0, %c0_1] : memref<1x8x128xbf16, #tpu.memory_space<vmem>>, vector<1x8x128xbf16>
    %6 = vector.shape_cast %5 : vector<1x8x128xbf16> to vector<8x128xbf16>
    %7 = arith.extf %6 : vector<8x128xbf16> to vector<8x128xf32>
    %c0_2 = arith.constant 0 : index
    %c0_3 = arith.constant 0 : index
    %c0_4 = arith.constant 0 : index
    %8 = vector.load %arg4[%c0_2, %c0_3, %c0_4] : memref<1x8x128xbf16, #tpu.memory_space<vmem>>, vector<1x8x128xbf16>
    %9 = vector.shape_cast %8 : vector<1x8x128xbf16> to vector<8x128xbf16>
    %10 = arith.extf %9 : vector<8x128xbf16> to vector<8x128xf32>
    %c0_5 = arith.constant 0 : index
    %c0_6 = arith.constant 0 : index
    %c0_7 = arith.constant 0 : index
    %11 = vector.load %arg5[%c0_5, %c0_6, %c0_7] : memref<1x8x128xbf16, #tpu.memory_space<vmem>>, vector<1x8x128xbf16>
    %12 = vector.shape_cast %11 : vector<1x8x128xbf16> to vector<8x128xbf16>
    %13 = arith.extf %12 : vector<8x128xbf16> to vector<8x128xf32>
    %14 = arith.index_cast %arg0 : i32 to index
    %15 = memref.load %arg2[%14] : memref<7xf32, #tpu.memory_space<smem>>
    %c4 = arith.constant 4 : index
    %16 = memref.load %arg2[%c4] : memref<7xf32, #tpu.memory_space<smem>>
    %c0_8 = arith.constant 0 : index
    %c0_9 = arith.constant 0 : index
    %c0_10 = arith.constant 0 : index
    %17 = vector.load %arg6[%c0_8, %c0_9, %c0_10] : memref<3x12x128xf32, #tpu.memory_space<vmem>>, vector<1x1x128xf32>
    %18 = vector.shape_cast %17 : vector<1x1x128xf32> to vector<1x128xf32>
    %c0_11 = arith.constant 0 : index
    %c1 = arith.constant 1 : index
    %c0_12 = arith.constant 0 : index
    %19 = vector.load %arg6[%c0_11, %c1, %c0_12] : memref<3x12x128xf32, #tpu.memory_space<vmem>>, vector<1x1x128xf32>
    %20 = vector.shape_cast %19 : vector<1x1x128xf32> to vector<1x128xf32>
    %21 = vector.broadcast %4 : vector<1x128xf32> to vector<8x128xf32>
    %22 = arith.mulf %7, %21 : vector<8x128xf32>
    %cst = arith.constant dense<0.000000e+00> : vector<8xf32>
    %23 = vector.multi_reduction <add>, %22, %cst [1] : vector<8x128xf32> to vector<8xf32>
    %24 = vector.shape_cast %23 : vector<8xf32> to vector<8x1xf32>
    %cst_13 = arith.constant 3.125000e-02 : f32
    %25 = vector.broadcast %cst_13 : f32 to vector<8x1xf32>
    %26 = arith.mulf %24, %25 : vector<8x1xf32>
    %27 = vector.broadcast %26 : vector<8x1xf32> to vector<8x128xf32>
    %28 = arith.subf %7, %27 : vector<8x128xf32>
    %29 = vector.broadcast %4 : vector<1x128xf32> to vector<8x128xf32>
    %30 = arith.mulf %28, %29 : vector<8x128xf32>
    %31 = arith.mulf %30, %30 : vector<8x128xf32>
    %cst_14 = arith.constant dense<0.000000e+00> : vector<8xf32>
    %32 = vector.multi_reduction <add>, %31, %cst_14 [1] : vector<8x128xf32> to vector<8xf32>
    %33 = vector.shape_cast %32 : vector<8xf32> to vector<8x1xf32>
    %cst_15 = arith.constant 3.125000e-02 : f32
    %34 = vector.broadcast %cst_15 : f32 to vector<8x1xf32>
    %35 = arith.mulf %33, %34 : vector<8x1xf32>
    %cst_16 = arith.constant 9.99999974E-6 : f32
    %36 = vector.broadcast %cst_16 : f32 to vector<8x1xf32>
    %37 = arith.addf %35, %36 : vector<8x1xf32>
    %38 = math.rsqrt %37 : vector<8x1xf32>
    %39 = vector.broadcast %38 : vector<8x1xf32> to vector<8x128xf32>
    %40 = arith.mulf %30, %39 : vector<8x128xf32>
    %41 = vector.broadcast %18 : vector<1x128xf32> to vector<8x128xf32>
    %42 = arith.mulf %40, %41 : vector<8x128xf32>
    %43 = vector.broadcast %20 : vector<1x128xf32> to vector<8x128xf32>
    %44 = arith.addf %42, %43 : vector<8x128xf32>
    %c0_17 = arith.constant 0 : index
    %c0_18 = arith.constant 0 : index
    %c0_19 = arith.constant 0 : index
    %c0_20 = arith.constant 0 : index
    %45 = vector.load %arg7[%c0_17, %c0_18, %c0_19, %c0_20] : memref<3x2x128x128xbf16, #tpu.memory_space<vmem>>, vector<1x1x128x128xbf16>
    %46 = vector.shape_cast %45 : vector<1x1x128x128xbf16> to vector<128x128xbf16>
    %47 = arith.truncf %44 : vector<8x128xf32> to vector<8x128xbf16>
    %cst_21 = arith.constant dense<0.000000e+00> : vector<8x128xf32>
    %48 = tpu.matmul %47, %46, %cst_21 {dimension_numbers = #tpu.dot_dimension_numbers<[1], [0], [0], [1], [0, 0, 1, 1], [], []>} : vector<8x128xbf16>, vector<128x128xbf16>, vector<8x128xf32> -> vector<8x128xf32>
    %c0_22 = arith.constant 0 : index
    %c2 = arith.constant 2 : index
    %c0_23 = arith.constant 0 : index
    %49 = vector.load %arg6[%c0_22, %c2, %c0_23] : memref<3x12x128xf32, #tpu.memory_space<vmem>>, vector<1x1x128xf32>
    %50 = vector.shape_cast %49 : vector<1x1x128xf32> to vector<1x128xf32>
    %51 = vector.broadcast %50 : vector<1x128xf32> to vector<8x128xf32>
    %52 = arith.addf %48, %51 : vector<8x128xf32>
    %cst_24 = arith.constant 0.000000e+00 : f32
    %53 = vector.broadcast %cst_24 : f32 to vector<8x128xf32>
    %54 = arith.maximumf %52, %53 : vector<8x128xf32>
    %c0_25 = arith.constant 0 : index
    %c0_26 = arith.constant 0 : index
    %c0_27 = arith.constant 0 : index
    %c0_28 = arith.constant 0 : index
    %55 = vector.load %arg8[%c0_25, %c0_26, %c0_27, %c0_28] : memref<3x2x128x128xbf16, #tpu.memory_space<vmem>>, vector<1x1x128x128xbf16>
    %56 = vector.shape_cast %55 : vector<1x1x128x128xbf16> to vector<128x128xbf16>
    %57 = arith.truncf %54 : vector<8x128xf32> to vector<8x128xbf16>
    %cst_29 = arith.constant dense<0.000000e+00> : vector<8x128xf32>
    %58 = tpu.matmul %57, %56, %cst_29 {dimension_numbers = #tpu.dot_dimension_numbers<[1], [0], [0], [1], [0, 0, 1, 1], [], []>} : vector<8x128xbf16>, vector<128x128xbf16>, vector<8x128xf32> -> vector<8x128xf32>
    %c0_30 = arith.constant 0 : index
    %c3 = arith.constant 3 : index
    %c0_31 = arith.constant 0 : index
    %59 = vector.load %arg6[%c0_30, %c3, %c0_31] : memref<3x12x128xf32, #tpu.memory_space<vmem>>, vector<1x1x128xf32>
    %60 = vector.shape_cast %59 : vector<1x1x128xf32> to vector<1x128xf32>
    %61 = vector.broadcast %60 : vector<1x128xf32> to vector<8x128xf32>
    %62 = arith.addf %58, %61 : vector<8x128xf32>
    %c0_32 = arith.constant 0 : index
    %c4_33 = arith.constant 4 : index
    %c0_34 = arith.constant 0 : index
    %63 = vector.load %arg6[%c0_32, %c4_33, %c0_34] : memref<3x12x128xf32, #tpu.memory_space<vmem>>, vector<1x1x128xf32>
    %64 = vector.shape_cast %63 : vector<1x1x128xf32> to vector<1x128xf32>
    %c0_35 = arith.constant 0 : index
    %c5 = arith.constant 5 : index
    %c0_36 = arith.constant 0 : index
    %65 = vector.load %arg6[%c0_35, %c5, %c0_36] : memref<3x12x128xf32, #tpu.memory_space<vmem>>, vector<1x1x128xf32>
    %66 = vector.shape_cast %65 : vector<1x1x128xf32> to vector<1x128xf32>
    %67 = vector.broadcast %4 : vector<1x128xf32> to vector<8x128xf32>
    %68 = arith.mulf %13, %67 : vector<8x128xf32>
    %cst_37 = arith.constant dense<0.000000e+00> : vector<8xf32>
    %69 = vector.multi_reduction <add>, %68, %cst_37 [1] : vector<8x128xf32> to vector<8xf32>
    %70 = vector.shape_cast %69 : vector<8xf32> to vector<8x1xf32>
    %cst_38 = arith.constant 3.125000e-02 : f32
    %71 = vector.broadcast %cst_38 : f32 to vector<8x1xf32>
    %72 = arith.mulf %70, %71 : vector<8x1xf32>
    %73 = vector.broadcast %72 : vector<8x1xf32> to vector<8x128xf32>
    %74 = arith.subf %13, %73 : vector<8x128xf32>
    %75 = vector.broadcast %4 : vector<1x128xf32> to vector<8x128xf32>
    %76 = arith.mulf %74, %75 : vector<8x128xf32>
    %77 = arith.mulf %76, %76 : vector<8x128xf32>
    %cst_39 = arith.constant dense<0.000000e+00> : vector<8xf32>
    %78 = vector.multi_reduction <add>, %77, %cst_39 [1] : vector<8x128xf32> to vector<8xf32>
    %79 = vector.shape_cast %78 : vector<8xf32> to vector<8x1xf32>
    %cst_40 = arith.constant 3.125000e-02 : f32
    %80 = vector.broadcast %cst_40 : f32 to vector<8x1xf32>
    %81 = arith.mulf %79, %80 : vector<8x1xf32>
    %cst_41 = arith.constant 9.99999974E-6 : f32
    %82 = vector.broadcast %cst_41 : f32 to vector<8x1xf32>
    %83 = arith.addf %81, %82 : vector<8x1xf32>
    %84 = math.rsqrt %83 : vector<8x1xf32>
    %85 = vector.broadcast %84 : vector<8x1xf32> to vector<8x128xf32>
    %86 = arith.mulf %76, %85 : vector<8x128xf32>
    %87 = vector.broadcast %64 : vector<1x128xf32> to vector<8x128xf32>
    %88 = arith.mulf %86, %87 : vector<8x128xf32>
    %89 = vector.broadcast %66 : vector<1x128xf32> to vector<8x128xf32>
    %90 = arith.addf %88, %89 : vector<8x128xf32>
    %c0_42 = arith.constant 0 : index
    %c1_43 = arith.constant 1 : index
    %c0_44 = arith.constant 0 : index
    %c0_45 = arith.constant 0 : index
    %91 = vector.load %arg7[%c0_42, %c1_43, %c0_44, %c0_45] : memref<3x2x128x128xbf16, #tpu.memory_space<vmem>>, vector<1x1x128x128xbf16>
    %92 = vector.shape_cast %91 : vector<1x1x128x128xbf16> to vector<128x128xbf16>
    %93 = arith.truncf %90 : vector<8x128xf32> to vector<8x128xbf16>
    %cst_46 = arith.constant dense<0.000000e+00> : vector<8x128xf32>
    %94 = tpu.matmul %93, %92, %cst_46 {dimension_numbers = #tpu.dot_dimension_numbers<[1], [0], [0], [1], [0, 0, 1, 1], [], []>} : vector<8x128xbf16>, vector<128x128xbf16>, vector<8x128xf32> -> vector<8x128xf32>
    %c0_47 = arith.constant 0 : index
    %c6 = arith.constant 6 : index
    %c0_48 = arith.constant 0 : index
    %95 = vector.load %arg6[%c0_47, %c6, %c0_48] : memref<3x12x128xf32, #tpu.memory_space<vmem>>, vector<1x1x128xf32>
    %96 = vector.shape_cast %95 : vector<1x1x128xf32> to vector<1x128xf32>
    %97 = vector.broadcast %96 : vector<1x128xf32> to vector<8x128xf32>
    %98 = arith.addf %94, %97 : vector<8x128xf32>
    %cst_49 = arith.constant 0.000000e+00 : f32
    %99 = vector.broadcast %cst_49 : f32 to vector<8x128xf32>
    %100 = arith.maximumf %98, %99 : vector<8x128xf32>
    %c0_50 = arith.constant 0 : index
    %c1_51 = arith.constant 1 : index
    %c0_52 = arith.constant 0 : index
    %c0_53 = arith.constant 0 : index
    %101 = vector.load %arg8[%c0_50, %c1_51, %c0_52, %c0_53] : memref<3x2x128x128xbf16, #tpu.memory_space<vmem>>, vector<1x1x128x128xbf16>
    %102 = vector.shape_cast %101 : vector<1x1x128x128xbf16> to vector<128x128xbf16>
    %103 = arith.truncf %100 : vector<8x128xf32> to vector<8x128xbf16>
    %cst_54 = arith.constant dense<0.000000e+00> : vector<8x128xf32>
    %104 = tpu.matmul %103, %102, %cst_54 {dimension_numbers = #tpu.dot_dimension_numbers<[1], [0], [0], [1], [0, 0, 1, 1], [], []>} : vector<8x128xbf16>, vector<128x128xbf16>, vector<8x128xf32> -> vector<8x128xf32>
    %c0_55 = arith.constant 0 : index
    %c7 = arith.constant 7 : index
    %c0_56 = arith.constant 0 : index
    %105 = vector.load %arg6[%c0_55, %c7, %c0_56] : memref<3x12x128xf32, #tpu.memory_space<vmem>>, vector<1x1x128xf32>
    %106 = vector.shape_cast %105 : vector<1x1x128xf32> to vector<1x128xf32>
    %107 = vector.broadcast %106 : vector<1x128xf32> to vector<8x128xf32>
    %108 = arith.addf %104, %107 : vector<8x128xf32>
    %c0_57 = arith.constant 0 : index
    %c8 = arith.constant 8 : index
    %c0_58 = arith.constant 0 : index
    %109 = vector.load %arg6[%c0_57, %c8, %c0_58] : memref<3x12x128xf32, #tpu.memory_space<vmem>>, vector<1x1x128xf32>
    %110 = vector.shape_cast %109 : vector<1x1x128xf32> to vector<1x128xf32>
    %111 = vector.broadcast %110 : vector<1x128xf32> to vector<8x128xf32>
    %112 = arith.mulf %62, %111 : vector<8x128xf32>
    %cst_59 = arith.constant dense<0.000000e+00> : vector<8xf32>
    %113 = vector.multi_reduction <add>, %112, %cst_59 [1] : vector<8x128xf32> to vector<8xf32>
    %114 = vector.shape_cast %113 : vector<8xf32> to vector<8x1xf32>
    %c0_60 = arith.constant 0 : index
    %c9 = arith.constant 9 : index
    %c0_61 = arith.constant 0 : index
    %115 = vector.load %arg6[%c0_60, %c9, %c0_61] : memref<3x12x128xf32, #tpu.memory_space<vmem>>, vector<1x1x128xf32>
    %116 = vector.shape_cast %115 : vector<1x1x128xf32> to vector<1x128xf32>
    %117 = vector.broadcast %116 : vector<1x128xf32> to vector<8x128xf32>
    %118 = arith.mulf %108, %117 : vector<8x128xf32>
    %cst_62 = arith.constant dense<0.000000e+00> : vector<8xf32>
    %119 = vector.multi_reduction <add>, %118, %cst_62 [1] : vector<8x128xf32> to vector<8xf32>
    %120 = vector.shape_cast %119 : vector<8xf32> to vector<8x1xf32>
    %121 = arith.addf %114, %120 : vector<8x1xf32>
    %122 = vector.broadcast %16 : f32 to vector<8x1xf32>
    %123 = arith.addf %121, %122 : vector<8x1xf32>
    %124 = arith.negf %123 : vector<8x1xf32>
    %125 = math.exp %124 : vector<8x1xf32>
    %cst_63 = arith.constant 1.000000e+00 : f32
    %126 = vector.broadcast %cst_63 : f32 to vector<8x1xf32>
    %127 = arith.addf %126, %125 : vector<8x1xf32>
    %128 = arith.divf %126, %127 : vector<8x1xf32>
    %129 = vector.broadcast %15 : f32 to vector<8x1xf32>
    %130 = arith.mulf %128, %129 : vector<8x1xf32>
    %cst_64 = arith.constant 1.500000e-01 : f32
    %cst_65 = arith.constant 8.500000e-01 : f32
    %131 = vector.broadcast %cst_64 : f32 to vector<8x1xf32>
    %132 = arith.maximumf %131, %130 : vector<8x1xf32>
    %133 = vector.broadcast %cst_65 : f32 to vector<8x1xf32>
    %134 = arith.minimumf %133, %132 : vector<8x1xf32>
    %135 = vector.broadcast %134 : vector<8x1xf32> to vector<8x128xf32>
    %136 = arith.mulf %62, %135 : vector<8x128xf32>
    %cst_66 = arith.constant 1.000000e+00 : f32
    %137 = vector.broadcast %cst_66 : f32 to vector<8x1xf32>
    %138 = arith.subf %137, %134 : vector<8x1xf32>
    %139 = vector.broadcast %138 : vector<8x1xf32> to vector<8x128xf32>
    %140 = arith.mulf %139, %108 : vector<8x128xf32>
    %141 = arith.addf %136, %140 : vector<8x128xf32>
    %c0_67 = arith.constant 0 : index
    %c10 = arith.constant 10 : index
    %c0_68 = arith.constant 0 : index
    %142 = vector.load %arg6[%c0_67, %c10, %c0_68] : memref<3x12x128xf32, #tpu.memory_space<vmem>>, vector<1x1x128xf32>
    %143 = vector.shape_cast %142 : vector<1x1x128xf32> to vector<1x128xf32>
    %c0_69 = arith.constant 0 : index
    %c11 = arith.constant 11 : index
    %c0_70 = arith.constant 0 : index
    %144 = vector.load %arg6[%c0_69, %c11, %c0_70] : memref<3x12x128xf32, #tpu.memory_space<vmem>>, vector<1x1x128xf32>
    %145 = vector.shape_cast %144 : vector<1x1x128xf32> to vector<1x128xf32>
    %146 = vector.broadcast %4 : vector<1x128xf32> to vector<8x128xf32>
    %147 = arith.mulf %141, %146 : vector<8x128xf32>
    %cst_71 = arith.constant dense<0.000000e+00> : vector<8xf32>
    %148 = vector.multi_reduction <add>, %147, %cst_71 [1] : vector<8x128xf32> to vector<8xf32>
    %149 = vector.shape_cast %148 : vector<8xf32> to vector<8x1xf32>
    %cst_72 = arith.constant 3.125000e-02 : f32
    %150 = vector.broadcast %cst_72 : f32 to vector<8x1xf32>
    %151 = arith.mulf %149, %150 : vector<8x1xf32>
    %152 = vector.broadcast %151 : vector<8x1xf32> to vector<8x128xf32>
    %153 = arith.subf %141, %152 : vector<8x128xf32>
    %154 = vector.broadcast %4 : vector<1x128xf32> to vector<8x128xf32>
    %155 = arith.mulf %153, %154 : vector<8x128xf32>
    %156 = arith.mulf %155, %155 : vector<8x128xf32>
    %cst_73 = arith.constant dense<0.000000e+00> : vector<8xf32>
    %157 = vector.multi_reduction <add>, %156, %cst_73 [1] : vector<8x128xf32> to vector<8xf32>
    %158 = vector.shape_cast %157 : vector<8xf32> to vector<8x1xf32>
    %cst_74 = arith.constant 3.125000e-02 : f32
    %159 = vector.broadcast %cst_74 : f32 to vector<8x1xf32>
    %160 = arith.mulf %158, %159 : vector<8x1xf32>
    %cst_75 = arith.constant 9.99999974E-6 : f32
    %161 = vector.broadcast %cst_75 : f32 to vector<8x1xf32>
    %162 = arith.addf %160, %161 : vector<8x1xf32>
    %163 = math.rsqrt %162 : vector<8x1xf32>
    %164 = vector.broadcast %163 : vector<8x1xf32> to vector<8x128xf32>
    %165 = arith.mulf %155, %164 : vector<8x128xf32>
    %166 = vector.broadcast %143 : vector<1x128xf32> to vector<8x128xf32>
    %167 = arith.mulf %165, %166 : vector<8x128xf32>
    %168 = vector.broadcast %145 : vector<1x128xf32> to vector<8x128xf32>
    %169 = arith.addf %167, %168 : vector<8x128xf32>
    %c2_i32 = arith.constant 2 : i32
    %170 = arith.addi %c2_i32, %arg0 : i32
    %171 = arith.index_cast %170 : i32 to index
    %172 = memref.load %arg2[%171] : memref<7xf32, #tpu.memory_space<smem>>
    %c5_76 = arith.constant 5 : index
    %173 = memref.load %arg2[%c5_76] : memref<7xf32, #tpu.memory_space<smem>>
    %c1_77 = arith.constant 1 : index
    %c0_78 = arith.constant 0 : index
    %c0_79 = arith.constant 0 : index
    %174 = vector.load %arg6[%c1_77, %c0_78, %c0_79] : memref<3x12x128xf32, #tpu.memory_space<vmem>>, vector<1x1x128xf32>
    %175 = vector.shape_cast %174 : vector<1x1x128xf32> to vector<1x128xf32>
    %c1_80 = arith.constant 1 : index
    %c1_81 = arith.constant 1 : index
    %c0_82 = arith.constant 0 : index
    %176 = vector.load %arg6[%c1_80, %c1_81, %c0_82] : memref<3x12x128xf32, #tpu.memory_space<vmem>>, vector<1x1x128xf32>
    %177 = vector.shape_cast %176 : vector<1x1x128xf32> to vector<1x128xf32>
    %178 = vector.broadcast %4 : vector<1x128xf32> to vector<8x128xf32>
    %179 = arith.mulf %10, %178 : vector<8x128xf32>
    %cst_83 = arith.constant dense<0.000000e+00> : vector<8xf32>
    %180 = vector.multi_reduction <add>, %179, %cst_83 [1] : vector<8x128xf32> to vector<8xf32>
    %181 = vector.shape_cast %180 : vector<8xf32> to vector<8x1xf32>
    %cst_84 = arith.constant 3.125000e-02 : f32
    %182 = vector.broadcast %cst_84 : f32 to vector<8x1xf32>
    %183 = arith.mulf %181, %182 : vector<8x1xf32>
    %184 = vector.broadcast %183 : vector<8x1xf32> to vector<8x128xf32>
    %185 = arith.subf %10, %184 : vector<8x128xf32>
    %186 = vector.broadcast %4 : vector<1x128xf32> to vector<8x128xf32>
    %187 = arith.mulf %185, %186 : vector<8x128xf32>
    %188 = arith.mulf %187, %187 : vector<8x128xf32>
    %cst_85 = arith.constant dense<0.000000e+00> : vector<8xf32>
    %189 = vector.multi_reduction <add>, %188, %cst_85 [1] : vector<8x128xf32> to vector<8xf32>
    %190 = vector.shape_cast %189 : vector<8xf32> to vector<8x1xf32>
    %cst_86 = arith.constant 3.125000e-02 : f32
    %191 = vector.broadcast %cst_86 : f32 to vector<8x1xf32>
    %192 = arith.mulf %190, %191 : vector<8x1xf32>
    %cst_87 = arith.constant 9.99999974E-6 : f32
    %193 = vector.broadcast %cst_87 : f32 to vector<8x1xf32>
    %194 = arith.addf %192, %193 : vector<8x1xf32>
    %195 = math.rsqrt %194 : vector<8x1xf32>
    %196 = vector.broadcast %195 : vector<8x1xf32> to vector<8x128xf32>
    %197 = arith.mulf %187, %196 : vector<8x128xf32>
    %198 = vector.broadcast %175 : vector<1x128xf32> to vector<8x128xf32>
    %199 = arith.mulf %197, %198 : vector<8x128xf32>
    %200 = vector.broadcast %177 : vector<1x128xf32> to vector<8x128xf32>
    %201 = arith.addf %199, %200 : vector<8x128xf32>
    %c1_88 = arith.constant 1 : index
    %c0_89 = arith.constant 0 : index
    %c0_90 = arith.constant 0 : index
    %c0_91 = arith.constant 0 : index
    %202 = vector.load %arg7[%c1_88, %c0_89, %c0_90, %c0_91] : memref<3x2x128x128xbf16, #tpu.memory_space<vmem>>, vector<1x1x128x128xbf16>
    %203 = vector.shape_cast %202 : vector<1x1x128x128xbf16> to vector<128x128xbf16>
    %204 = arith.truncf %201 : vector<8x128xf32> to vector<8x128xbf16>
    %cst_92 = arith.constant dense<0.000000e+00> : vector<8x128xf32>
    %205 = tpu.matmul %204, %203, %cst_92 {dimension_numbers = #tpu.dot_dimension_numbers<[1], [0], [0], [1], [0, 0, 1, 1], [], []>} : vector<8x128xbf16>, vector<128x128xbf16>, vector<8x128xf32> -> vector<8x128xf32>
    %c1_93 = arith.constant 1 : index
    %c2_94 = arith.constant 2 : index
    %c0_95 = arith.constant 0 : index
    %206 = vector.load %arg6[%c1_93, %c2_94, %c0_95] : memref<3x12x128xf32, #tpu.memory_space<vmem>>, vector<1x1x128xf32>
    %207 = vector.shape_cast %206 : vector<1x1x128xf32> to vector<1x128xf32>
    %208 = vector.broadcast %207 : vector<1x128xf32> to vector<8x128xf32>
    %209 = arith.addf %205, %208 : vector<8x128xf32>
    %cst_96 = arith.constant 0.000000e+00 : f32
    %210 = vector.broadcast %cst_96 : f32 to vector<8x128xf32>
    %211 = arith.maximumf %209, %210 : vector<8x128xf32>
    %c1_97 = arith.constant 1 : index
    %c0_98 = arith.constant 0 : index
    %c0_99 = arith.constant 0 : index
    %c0_100 = arith.constant 0 : index
    %212 = vector.load %arg8[%c1_97, %c0_98, %c0_99, %c0_100] : memref<3x2x128x128xbf16, #tpu.memory_space<vmem>>, vector<1x1x128x128xbf16>
    %213 = vector.shape_cast %212 : vector<1x1x128x128xbf16> to vector<128x128xbf16>
    %214 = arith.truncf %211 : vector<8x128xf32> to vector<8x128xbf16>
    %cst_101 = arith.constant dense<0.000000e+00> : vector<8x128xf32>
    %215 = tpu.matmul %214, %213, %cst_101 {dimension_numbers = #tpu.dot_dimension_numbers<[1], [0], [0], [1], [0, 0, 1, 1], [], []>} : vector<8x128xbf16>, vector<128x128xbf16>, vector<8x128xf32> -> vector<8x128xf32>
    %c1_102 = arith.constant 1 : index
    %c3_103 = arith.constant 3 : index
    %c0_104 = arith.constant 0 : index
    %216 = vector.load %arg6[%c1_102, %c3_103, %c0_104] : memref<3x12x128xf32, #tpu.memory_space<vmem>>, vector<1x1x128xf32>
    %217 = vector.shape_cast %216 : vector<1x1x128xf32> to vector<1x128xf32>
    %218 = vector.broadcast %217 : vector<1x128xf32> to vector<8x128xf32>
    %219 = arith.addf %215, %218 : vector<8x128xf32>
    %c1_105 = arith.constant 1 : index
    %c4_106 = arith.constant 4 : index
    %c0_107 = arith.constant 0 : index
    %220 = vector.load %arg6[%c1_105, %c4_106, %c0_107] : memref<3x12x128xf32, #tpu.memory_space<vmem>>, vector<1x1x128xf32>
    %221 = vector.shape_cast %220 : vector<1x1x128xf32> to vector<1x128xf32>
    %c1_108 = arith.constant 1 : index
    %c5_109 = arith.constant 5 : index
    %c0_110 = arith.constant 0 : index
    %222 = vector.load %arg6[%c1_108, %c5_109, %c0_110] : memref<3x12x128xf32, #tpu.memory_space<vmem>>, vector<1x1x128xf32>
    %223 = vector.shape_cast %222 : vector<1x1x128xf32> to vector<1x128xf32>
    %224 = vector.broadcast %4 : vector<1x128xf32> to vector<8x128xf32>
    %225 = arith.mulf %13, %224 : vector<8x128xf32>
    %cst_111 = arith.constant dense<0.000000e+00> : vector<8xf32>
    %226 = vector.multi_reduction <add>, %225, %cst_111 [1] : vector<8x128xf32> to vector<8xf32>
    %227 = vector.shape_cast %226 : vector<8xf32> to vector<8x1xf32>
    %cst_112 = arith.constant 3.125000e-02 : f32
    %228 = vector.broadcast %cst_112 : f32 to vector<8x1xf32>
    %229 = arith.mulf %227, %228 : vector<8x1xf32>
    %230 = vector.broadcast %229 : vector<8x1xf32> to vector<8x128xf32>
    %231 = arith.subf %13, %230 : vector<8x128xf32>
    %232 = vector.broadcast %4 : vector<1x128xf32> to vector<8x128xf32>
    %233 = arith.mulf %231, %232 : vector<8x128xf32>
    %234 = arith.mulf %233, %233 : vector<8x128xf32>
    %cst_113 = arith.constant dense<0.000000e+00> : vector<8xf32>
    %235 = vector.multi_reduction <add>, %234, %cst_113 [1] : vector<8x128xf32> to vector<8xf32>
    %236 = vector.shape_cast %235 : vector<8xf32> to vector<8x1xf32>
    %cst_114 = arith.constant 3.125000e-02 : f32
    %237 = vector.broadcast %cst_114 : f32 to vector<8x1xf32>
    %238 = arith.mulf %236, %237 : vector<8x1xf32>
    %cst_115 = arith.constant 9.99999974E-6 : f32
    %239 = vector.broadcast %cst_115 : f32 to vector<8x1xf32>
    %240 = arith.addf %238, %239 : vector<8x1xf32>
    %241 = math.rsqrt %240 : vector<8x1xf32>
    %242 = vector.broadcast %241 : vector<8x1xf32> to vector<8x128xf32>
    %243 = arith.mulf %233, %242 : vector<8x128xf32>
    %244 = vector.broadcast %221 : vector<1x128xf32> to vector<8x128xf32>
    %245 = arith.mulf %243, %244 : vector<8x128xf32>
    %246 = vector.broadcast %223 : vector<1x128xf32> to vector<8x128xf32>
    %247 = arith.addf %245, %246 : vector<8x128xf32>
    %c1_116 = arith.constant 1 : index
    %c1_117 = arith.constant 1 : index
    %c0_118 = arith.constant 0 : index
    %c0_119 = arith.constant 0 : index
    %248 = vector.load %arg7[%c1_116, %c1_117, %c0_118, %c0_119] : memref<3x2x128x128xbf16, #tpu.memory_space<vmem>>, vector<1x1x128x128xbf16>
    %249 = vector.shape_cast %248 : vector<1x1x128x128xbf16> to vector<128x128xbf16>
    %250 = arith.truncf %247 : vector<8x128xf32> to vector<8x128xbf16>
    %cst_120 = arith.constant dense<0.000000e+00> : vector<8x128xf32>
    %251 = tpu.matmul %250, %249, %cst_120 {dimension_numbers = #tpu.dot_dimension_numbers<[1], [0], [0], [1], [0, 0, 1, 1], [], []>} : vector<8x128xbf16>, vector<128x128xbf16>, vector<8x128xf32> -> vector<8x128xf32>
    %c1_121 = arith.constant 1 : index
    %c6_122 = arith.constant 6 : index
    %c0_123 = arith.constant 0 : index
    %252 = vector.load %arg6[%c1_121, %c6_122, %c0_123] : memref<3x12x128xf32, #tpu.memory_space<vmem>>, vector<1x1x128xf32>
    %253 = vector.shape_cast %252 : vector<1x1x128xf32> to vector<1x128xf32>
    %254 = vector.broadcast %253 : vector<1x128xf32> to vector<8x128xf32>
    %255 = arith.addf %251, %254 : vector<8x128xf32>
    %cst_124 = arith.constant 0.000000e+00 : f32
    %256 = vector.broadcast %cst_124 : f32 to vector<8x128xf32>
    %257 = arith.maximumf %255, %256 : vector<8x128xf32>
    %c1_125 = arith.constant 1 : index
    %c1_126 = arith.constant 1 : index
    %c0_127 = arith.constant 0 : index
    %c0_128 = arith.constant 0 : index
    %258 = vector.load %arg8[%c1_125, %c1_126, %c0_127, %c0_128] : memref<3x2x128x128xbf16, #tpu.memory_space<vmem>>, vector<1x1x128x128xbf16>
    %259 = vector.shape_cast %258 : vector<1x1x128x128xbf16> to vector<128x128xbf16>
    %260 = arith.truncf %257 : vector<8x128xf32> to vector<8x128xbf16>
    %cst_129 = arith.constant dense<0.000000e+00> : vector<8x128xf32>
    %261 = tpu.matmul %260, %259, %cst_129 {dimension_numbers = #tpu.dot_dimension_numbers<[1], [0], [0], [1], [0, 0, 1, 1], [], []>} : vector<8x128xbf16>, vector<128x128xbf16>, vector<8x128xf32> -> vector<8x128xf32>
    %c1_130 = arith.constant 1 : index
    %c7_131 = arith.constant 7 : index
    %c0_132 = arith.constant 0 : index
    %262 = vector.load %arg6[%c1_130, %c7_131, %c0_132] : memref<3x12x128xf32, #tpu.memory_space<vmem>>, vector<1x1x128xf32>
    %263 = vector.shape_cast %262 : vector<1x1x128xf32> to vector<1x128xf32>
    %264 = vector.broadcast %263 : vector<1x128xf32> to vector<8x128xf32>
    %265 = arith.addf %261, %264 : vector<8x128xf32>
    %c1_133 = arith.constant 1 : index
    %c8_134 = arith.constant 8 : index
    %c0_135 = arith.constant 0 : index
    %266 = vector.load %arg6[%c1_133, %c8_134, %c0_135] : memref<3x12x128xf32, #tpu.memory_space<vmem>>, vector<1x1x128xf32>
    %267 = vector.shape_cast %266 : vector<1x1x128xf32> to vector<1x128xf32>
    %268 = vector.broadcast %267 : vector<1x128xf32> to vector<8x128xf32>
    %269 = arith.mulf %219, %268 : vector<8x128xf32>
    %cst_136 = arith.constant dense<0.000000e+00> : vector<8xf32>
    %270 = vector.multi_reduction <add>, %269, %cst_136 [1] : vector<8x128xf32> to vector<8xf32>
    %271 = vector.shape_cast %270 : vector<8xf32> to vector<8x1xf32>
    %c1_137 = arith.constant 1 : index
    %c9_138 = arith.constant 9 : index
    %c0_139 = arith.constant 0 : index
    %272 = vector.load %arg6[%c1_137, %c9_138, %c0_139] : memref<3x12x128xf32, #tpu.memory_space<vmem>>, vector<1x1x128xf32>
    %273 = vector.shape_cast %272 : vector<1x1x128xf32> to vector<1x128xf32>
    %274 = vector.broadcast %273 : vector<1x128xf32> to vector<8x128xf32>
    %275 = arith.mulf %265, %274 : vector<8x128xf32>
    %cst_140 = arith.constant dense<0.000000e+00> : vector<8xf32>
    %276 = vector.multi_reduction <add>, %275, %cst_140 [1] : vector<8x128xf32> to vector<8xf32>
    %277 = vector.shape_cast %276 : vector<8xf32> to vector<8x1xf32>
    %278 = arith.addf %271, %277 : vector<8x1xf32>
    %279 = vector.broadcast %173 : f32 to vector<8x1xf32>
    %280 = arith.addf %278, %279 : vector<8x1xf32>
    %281 = arith.negf %280 : vector<8x1xf32>
    %282 = math.exp %281 : vector<8x1xf32>
    %cst_141 = arith.constant 1.000000e+00 : f32
    %283 = vector.broadcast %cst_141 : f32 to vector<8x1xf32>
    %284 = arith.addf %283, %282 : vector<8x1xf32>
    %285 = arith.divf %283, %284 : vector<8x1xf32>
    %286 = vector.broadcast %172 : f32 to vector<8x1xf32>
    %287 = arith.mulf %285, %286 : vector<8x1xf32>
    %cst_142 = arith.constant 1.500000e-01 : f32
    %cst_143 = arith.constant 8.500000e-01 : f32
    %288 = vector.broadcast %cst_142 : f32 to vector<8x1xf32>
    %289 = arith.maximumf %288, %287 : vector<8x1xf32>
    %290 = vector.broadcast %cst_143 : f32 to vector<8x1xf32>
    %291 = arith.minimumf %290, %289 : vector<8x1xf32>
    %292 = vector.broadcast %291 : vector<8x1xf32> to vector<8x128xf32>
    %293 = arith.mulf %219, %292 : vector<8x128xf32>
    %cst_144 = arith.constant 1.000000e+00 : f32
    %294 = vector.broadcast %cst_144 : f32 to vector<8x1xf32>
    %295 = arith.subf %294, %291 : vector<8x1xf32>
    %296 = vector.broadcast %295 : vector<8x1xf32> to vector<8x128xf32>
    %297 = arith.mulf %296, %265 : vector<8x128xf32>
    %298 = arith.addf %293, %297 : vector<8x128xf32>
    %c1_145 = arith.constant 1 : index
    %c10_146 = arith.constant 10 : index
    %c0_147 = arith.constant 0 : index
    %299 = vector.load %arg6[%c1_145, %c10_146, %c0_147] : memref<3x12x128xf32, #tpu.memory_space<vmem>>, vector<1x1x128xf32>
    %300 = vector.shape_cast %299 : vector<1x1x128xf32> to vector<1x128xf32>
    %c1_148 = arith.constant 1 : index
    %c11_149 = arith.constant 11 : index
    %c0_150 = arith.constant 0 : index
    %301 = vector.load %arg6[%c1_148, %c11_149, %c0_150] : memref<3x12x128xf32, #tpu.memory_space<vmem>>, vector<1x1x128xf32>
    %302 = vector.shape_cast %301 : vector<1x1x128xf32> to vector<1x128xf32>
    %303 = vector.broadcast %4 : vector<1x128xf32> to vector<8x128xf32>
    %304 = arith.mulf %298, %303 : vector<8x128xf32>
    %cst_151 = arith.constant dense<0.000000e+00> : vector<8xf32>
    %305 = vector.multi_reduction <add>, %304, %cst_151 [1] : vector<8x128xf32> to vector<8xf32>
    %306 = vector.shape_cast %305 : vector<8xf32> to vector<8x1xf32>
    %cst_152 = arith.constant 3.125000e-02 : f32
    %307 = vector.broadcast %cst_152 : f32 to vector<8x1xf32>
    %308 = arith.mulf %306, %307 : vector<8x1xf32>
    %309 = vector.broadcast %308 : vector<8x1xf32> to vector<8x128xf32>
    %310 = arith.subf %298, %309 : vector<8x128xf32>
    %311 = vector.broadcast %4 : vector<1x128xf32> to vector<8x128xf32>
    %312 = arith.mulf %310, %311 : vector<8x128xf32>
    %313 = arith.mulf %312, %312 : vector<8x128xf32>
    %cst_153 = arith.constant dense<0.000000e+00> : vector<8xf32>
    %314 = vector.multi_reduction <add>, %313, %cst_153 [1] : vector<8x128xf32> to vector<8xf32>
    %315 = vector.shape_cast %314 : vector<8xf32> to vector<8x1xf32>
    %cst_154 = arith.constant 3.125000e-02 : f32
    %316 = vector.broadcast %cst_154 : f32 to vector<8x1xf32>
    %317 = arith.mulf %315, %316 : vector<8x1xf32>
    %cst_155 = arith.constant 9.99999974E-6 : f32
    %318 = vector.broadcast %cst_155 : f32 to vector<8x1xf32>
    %319 = arith.addf %317, %318 : vector<8x1xf32>
    %320 = math.rsqrt %319 : vector<8x1xf32>
    %321 = vector.broadcast %320 : vector<8x1xf32> to vector<8x128xf32>
    %322 = arith.mulf %312, %321 : vector<8x128xf32>
    %323 = vector.broadcast %300 : vector<1x128xf32> to vector<8x128xf32>
    %324 = arith.mulf %322, %323 : vector<8x128xf32>
    %325 = vector.broadcast %302 : vector<1x128xf32> to vector<8x128xf32>
    %326 = arith.addf %324, %325 : vector<8x128xf32>
    %c6_156 = arith.constant 6 : index
    %327 = memref.load %arg2[%c6_156] : memref<7xf32, #tpu.memory_space<smem>>
    %c2_157 = arith.constant 2 : index
    %c0_158 = arith.constant 0 : index
    %c0_159 = arith.constant 0 : index
    %328 = vector.load %arg6[%c2_157, %c0_158, %c0_159] : memref<3x12x128xf32, #tpu.memory_space<vmem>>, vector<1x1x128xf32>
    %329 = vector.shape_cast %328 : vector<1x1x128xf32> to vector<1x128xf32>
    %c2_160 = arith.constant 2 : index
    %c1_161 = arith.constant 1 : index
    %c0_162 = arith.constant 0 : index
    %330 = vector.load %arg6[%c2_160, %c1_161, %c0_162] : memref<3x12x128xf32, #tpu.memory_space<vmem>>, vector<1x1x128xf32>
    %331 = vector.shape_cast %330 : vector<1x1x128xf32> to vector<1x128xf32>
    %332 = vector.broadcast %4 : vector<1x128xf32> to vector<8x128xf32>
    %333 = arith.mulf %169, %332 : vector<8x128xf32>
    %cst_163 = arith.constant dense<0.000000e+00> : vector<8xf32>
    %334 = vector.multi_reduction <add>, %333, %cst_163 [1] : vector<8x128xf32> to vector<8xf32>
    %335 = vector.shape_cast %334 : vector<8xf32> to vector<8x1xf32>
    %cst_164 = arith.constant 3.125000e-02 : f32
    %336 = vector.broadcast %cst_164 : f32 to vector<8x1xf32>
    %337 = arith.mulf %335, %336 : vector<8x1xf32>
    %338 = vector.broadcast %337 : vector<8x1xf32> to vector<8x128xf32>
    %339 = arith.subf %169, %338 : vector<8x128xf32>
    %340 = vector.broadcast %4 : vector<1x128xf32> to vector<8x128xf32>
    %341 = arith.mulf %339, %340 : vector<8x128xf32>
    %342 = arith.mulf %341, %341 : vector<8x128xf32>
    %cst_165 = arith.constant dense<0.000000e+00> : vector<8xf32>
    %343 = vector.multi_reduction <add>, %342, %cst_165 [1] : vector<8x128xf32> to vector<8xf32>
    %344 = vector.shape_cast %343 : vector<8xf32> to vector<8x1xf32>
    %cst_166 = arith.constant 3.125000e-02 : f32
    %345 = vector.broadcast %cst_166 : f32 to vector<8x1xf32>
    %346 = arith.mulf %344, %345 : vector<8x1xf32>
    %cst_167 = arith.constant 9.99999974E-6 : f32
    %347 = vector.broadcast %cst_167 : f32 to vector<8x1xf32>
    %348 = arith.addf %346, %347 : vector<8x1xf32>
    %349 = math.rsqrt %348 : vector<8x1xf32>
    %350 = vector.broadcast %349 : vector<8x1xf32> to vector<8x128xf32>
    %351 = arith.mulf %341, %350 : vector<8x128xf32>
    %352 = vector.broadcast %329 : vector<1x128xf32> to vector<8x128xf32>
    %353 = arith.mulf %351, %352 : vector<8x128xf32>
    %354 = vector.broadcast %331 : vector<1x128xf32> to vector<8x128xf32>
    %355 = arith.addf %353, %354 : vector<8x128xf32>
    %c2_168 = arith.constant 2 : index
    %c0_169 = arith.constant 0 : index
    %c0_170 = arith.constant 0 : index
    %c0_171 = arith.constant 0 : index
    %356 = vector.load %arg7[%c2_168, %c0_169, %c0_170, %c0_171] : memref<3x2x128x128xbf16, #tpu.memory_space<vmem>>, vector<1x1x128x128xbf16>
    %357 = vector.shape_cast %356 : vector<1x1x128x128xbf16> to vector<128x128xbf16>
    %358 = arith.truncf %355 : vector<8x128xf32> to vector<8x128xbf16>
    %cst_172 = arith.constant dense<0.000000e+00> : vector<8x128xf32>
    %359 = tpu.matmul %358, %357, %cst_172 {dimension_numbers = #tpu.dot_dimension_numbers<[1], [0], [0], [1], [0, 0, 1, 1], [], []>} : vector<8x128xbf16>, vector<128x128xbf16>, vector<8x128xf32> -> vector<8x128xf32>
    %c2_173 = arith.constant 2 : index
    %c2_174 = arith.constant 2 : index
    %c0_175 = arith.constant 0 : index
    %360 = vector.load %arg6[%c2_173, %c2_174, %c0_175] : memref<3x12x128xf32, #tpu.memory_space<vmem>>, vector<1x1x128xf32>
    %361 = vector.shape_cast %360 : vector<1x1x128xf32> to vector<1x128xf32>
    %362 = vector.broadcast %361 : vector<1x128xf32> to vector<8x128xf32>
    %363 = arith.addf %359, %362 : vector<8x128xf32>
    %cst_176 = arith.constant 0.000000e+00 : f32
    %364 = vector.broadcast %cst_176 : f32 to vector<8x128xf32>
    %365 = arith.maximumf %363, %364 : vector<8x128xf32>
    %c2_177 = arith.constant 2 : index
    %c0_178 = arith.constant 0 : index
    %c0_179 = arith.constant 0 : index
    %c0_180 = arith.constant 0 : index
    %366 = vector.load %arg8[%c2_177, %c0_178, %c0_179, %c0_180] : memref<3x2x128x128xbf16, #tpu.memory_space<vmem>>, vector<1x1x128x128xbf16>
    %367 = vector.shape_cast %366 : vector<1x1x128x128xbf16> to vector<128x128xbf16>
    %368 = arith.truncf %365 : vector<8x128xf32> to vector<8x128xbf16>
    %cst_181 = arith.constant dense<0.000000e+00> : vector<8x128xf32>
    %369 = tpu.matmul %368, %367, %cst_181 {dimension_numbers = #tpu.dot_dimension_numbers<[1], [0], [0], [1], [0, 0, 1, 1], [], []>} : vector<8x128xbf16>, vector<128x128xbf16>, vector<8x128xf32> -> vector<8x128xf32>
    %c2_182 = arith.constant 2 : index
    %c3_183 = arith.constant 3 : index
    %c0_184 = arith.constant 0 : index
    %370 = vector.load %arg6[%c2_182, %c3_183, %c0_184] : memref<3x12x128xf32, #tpu.memory_space<vmem>>, vector<1x1x128xf32>
    %371 = vector.shape_cast %370 : vector<1x1x128xf32> to vector<1x128xf32>
    %372 = vector.broadcast %371 : vector<1x128xf32> to vector<8x128xf32>
    %373 = arith.addf %369, %372 : vector<8x128xf32>
    %c2_185 = arith.constant 2 : index
    %c4_186 = arith.constant 4 : index
    %c0_187 = arith.constant 0 : index
    %374 = vector.load %arg6[%c2_185, %c4_186, %c0_187] : memref<3x12x128xf32, #tpu.memory_space<vmem>>, vector<1x1x128xf32>
    %375 = vector.shape_cast %374 : vector<1x1x128xf32> to vector<1x128xf32>
    %c2_188 = arith.constant 2 : index
    %c5_189 = arith.constant 5 : index
    %c0_190 = arith.constant 0 : index
    %376 = vector.load %arg6[%c2_188, %c5_189, %c0_190] : memref<3x12x128xf32, #tpu.memory_space<vmem>>, vector<1x1x128xf32>
    %377 = vector.shape_cast %376 : vector<1x1x128xf32> to vector<1x128xf32>
    %378 = vector.broadcast %4 : vector<1x128xf32> to vector<8x128xf32>
    %379 = arith.mulf %326, %378 : vector<8x128xf32>
    %cst_191 = arith.constant dense<0.000000e+00> : vector<8xf32>
    %380 = vector.multi_reduction <add>, %379, %cst_191 [1] : vector<8x128xf32> to vector<8xf32>
    %381 = vector.shape_cast %380 : vector<8xf32> to vector<8x1xf32>
    %cst_192 = arith.constant 3.125000e-02 : f32
    %382 = vector.broadcast %cst_192 : f32 to vector<8x1xf32>
    %383 = arith.mulf %381, %382 : vector<8x1xf32>
    %384 = vector.broadcast %383 : vector<8x1xf32> to vector<8x128xf32>
    %385 = arith.subf %326, %384 : vector<8x128xf32>
    %386 = vector.broadcast %4 : vector<1x128xf32> to vector<8x128xf32>
    %387 = arith.mulf %385, %386 : vector<8x128xf32>
    %388 = arith.mulf %387, %387 : vector<8x128xf32>
    %cst_193 = arith.constant dense<0.000000e+00> : vector<8xf32>
    %389 = vector.multi_reduction <add>, %388, %cst_193 [1] : vector<8x128xf32> to vector<8xf32>
    %390 = vector.shape_cast %389 : vector<8xf32> to vector<8x1xf32>
    %cst_194 = arith.constant 3.125000e-02 : f32
    %391 = vector.broadcast %cst_194 : f32 to vector<8x1xf32>
    %392 = arith.mulf %390, %391 : vector<8x1xf32>
    %cst_195 = arith.constant 9.99999974E-6 : f32
    %393 = vector.broadcast %cst_195 : f32 to vector<8x1xf32>
    %394 = arith.addf %392, %393 : vector<8x1xf32>
    %395 = math.rsqrt %394 : vector<8x1xf32>
    %396 = vector.broadcast %395 : vector<8x1xf32> to vector<8x128xf32>
    %397 = arith.mulf %387, %396 : vector<8x128xf32>
    %398 = vector.broadcast %375 : vector<1x128xf32> to vector<8x128xf32>
    %399 = arith.mulf %397, %398 : vector<8x128xf32>
    %400 = vector.broadcast %377 : vector<1x128xf32> to vector<8x128xf32>
    %401 = arith.addf %399, %400 : vector<8x128xf32>
    %c2_196 = arith.constant 2 : index
    %c1_197 = arith.constant 1 : index
    %c0_198 = arith.constant 0 : index
    %c0_199 = arith.constant 0 : index
    %402 = vector.load %arg7[%c2_196, %c1_197, %c0_198, %c0_199] : memref<3x2x128x128xbf16, #tpu.memory_space<vmem>>, vector<1x1x128x128xbf16>
    %403 = vector.shape_cast %402 : vector<1x1x128x128xbf16> to vector<128x128xbf16>
    %404 = arith.truncf %401 : vector<8x128xf32> to vector<8x128xbf16>
    %cst_200 = arith.constant dense<0.000000e+00> : vector<8x128xf32>
    %405 = tpu.matmul %404, %403, %cst_200 {dimension_numbers = #tpu.dot_dimension_numbers<[1], [0], [0], [1], [0, 0, 1, 1], [], []>} : vector<8x128xbf16>, vector<128x128xbf16>, vector<8x128xf32> -> vector<8x128xf32>
    %c2_201 = arith.constant 2 : index
    %c6_202 = arith.constant 6 : index
    %c0_203 = arith.constant 0 : index
    %406 = vector.load %arg6[%c2_201, %c6_202, %c0_203] : memref<3x12x128xf32, #tpu.memory_space<vmem>>, vector<1x1x128xf32>
    %407 = vector.shape_cast %406 : vector<1x1x128xf32> to vector<1x128xf32>
    %408 = vector.broadcast %407 : vector<1x128xf32> to vector<8x128xf32>
    %409 = arith.addf %405, %408 : vector<8x128xf32>
    %cst_204 = arith.constant 0.000000e+00 : f32
    %410 = vector.broadcast %cst_204 : f32 to vector<8x128xf32>
    %411 = arith.maximumf %409, %410 : vector<8x128xf32>
    %c2_205 = arith.constant 2 : index
    %c1_206 = arith.constant 1 : index
    %c0_207 = arith.constant 0 : index
    %c0_208 = arith.constant 0 : index
    %412 = vector.load %arg8[%c2_205, %c1_206, %c0_207, %c0_208] : memref<3x2x128x128xbf16, #tpu.memory_space<vmem>>, vector<1x1x128x128xbf16>
    %413 = vector.shape_cast %412 : vector<1x1x128x128xbf16> to vector<128x128xbf16>
    %414 = arith.truncf %411 : vector<8x128xf32> to vector<8x128xbf16>
    %cst_209 = arith.constant dense<0.000000e+00> : vector<8x128xf32>
    %415 = tpu.matmul %414, %413, %cst_209 {dimension_numbers = #tpu.dot_dimension_numbers<[1], [0], [0], [1], [0, 0, 1, 1], [], []>} : vector<8x128xbf16>, vector<128x128xbf16>, vector<8x128xf32> -> vector<8x128xf32>
    %c2_210 = arith.constant 2 : index
    %c7_211 = arith.constant 7 : index
    %c0_212 = arith.constant 0 : index
    %416 = vector.load %arg6[%c2_210, %c7_211, %c0_212] : memref<3x12x128xf32, #tpu.memory_space<vmem>>, vector<1x1x128xf32>
    %417 = vector.shape_cast %416 : vector<1x1x128xf32> to vector<1x128xf32>
    %418 = vector.broadcast %417 : vector<1x128xf32> to vector<8x128xf32>
    %419 = arith.addf %415, %418 : vector<8x128xf32>
    %c2_213 = arith.constant 2 : index
    %c8_214 = arith.constant 8 : index
    %c0_215 = arith.constant 0 : index
    %420 = vector.load %arg6[%c2_213, %c8_214, %c0_215] : memref<3x12x128xf32, #tpu.memory_space<vmem>>, vector<1x1x128xf32>
    %421 = vector.shape_cast %420 : vector<1x1x128xf32> to vector<1x128xf32>
    %422 = vector.broadcast %421 : vector<1x128xf32> to vector<8x128xf32>
    %423 = arith.mulf %373, %422 : vector<8x128xf32>
    %cst_216 = arith.constant dense<0.000000e+00> : vector<8xf32>
    %424 = vector.multi_reduction <add>, %423, %cst_216 [1] : vector<8x128xf32> to vector<8xf32>
    %425 = vector.shape_cast %424 : vector<8xf32> to vector<8x1xf32>
    %c2_217 = arith.constant 2 : index
    %c9_218 = arith.constant 9 : index
    %c0_219 = arith.constant 0 : index
    %426 = vector.load %arg6[%c2_217, %c9_218, %c0_219] : memref<3x12x128xf32, #tpu.memory_space<vmem>>, vector<1x1x128xf32>
    %427 = vector.shape_cast %426 : vector<1x1x128xf32> to vector<1x128xf32>
    %428 = vector.broadcast %427 : vector<1x128xf32> to vector<8x128xf32>
    %429 = arith.mulf %419, %428 : vector<8x128xf32>
    %cst_220 = arith.constant dense<0.000000e+00> : vector<8xf32>
    %430 = vector.multi_reduction <add>, %429, %cst_220 [1] : vector<8x128xf32> to vector<8xf32>
    %431 = vector.shape_cast %430 : vector<8xf32> to vector<8x1xf32>
    %432 = arith.addf %425, %431 : vector<8x1xf32>
    %433 = vector.broadcast %327 : f32 to vector<8x1xf32>
    %434 = arith.addf %432, %433 : vector<8x1xf32>
    %435 = arith.negf %434 : vector<8x1xf32>
    %436 = math.exp %435 : vector<8x1xf32>
    %cst_221 = arith.constant 1.000000e+00 : f32
    %437 = vector.broadcast %cst_221 : f32 to vector<8x1xf32>
    %438 = arith.addf %437, %436 : vector<8x1xf32>
    %439 = arith.divf %437, %438 : vector<8x1xf32>
    %cst_222 = arith.constant 1.000000e+00 : f32
    %440 = vector.broadcast %cst_222 : f32 to vector<8x1xf32>
    %441 = arith.mulf %439, %440 : vector<8x1xf32>
    %cst_223 = arith.constant 1.500000e-01 : f32
    %cst_224 = arith.constant 8.500000e-01 : f32
    %442 = vector.broadcast %cst_223 : f32 to vector<8x1xf32>
    %443 = arith.maximumf %442, %441 : vector<8x1xf32>
    %444 = vector.broadcast %cst_224 : f32 to vector<8x1xf32>
    %445 = arith.minimumf %444, %443 : vector<8x1xf32>
    %446 = vector.broadcast %445 : vector<8x1xf32> to vector<8x128xf32>
    %447 = arith.mulf %373, %446 : vector<8x128xf32>
    %cst_225 = arith.constant 1.000000e+00 : f32
    %448 = vector.broadcast %cst_225 : f32 to vector<8x1xf32>
    %449 = arith.subf %448, %445 : vector<8x1xf32>
    %450 = vector.broadcast %449 : vector<8x1xf32> to vector<8x128xf32>
    %451 = arith.mulf %450, %419 : vector<8x128xf32>
    %452 = arith.addf %447, %451 : vector<8x128xf32>
    %c2_226 = arith.constant 2 : index
    %c10_227 = arith.constant 10 : index
    %c0_228 = arith.constant 0 : index
    %453 = vector.load %arg6[%c2_226, %c10_227, %c0_228] : memref<3x12x128xf32, #tpu.memory_space<vmem>>, vector<1x1x128xf32>
    %454 = vector.shape_cast %453 : vector<1x1x128xf32> to vector<1x128xf32>
    %c2_229 = arith.constant 2 : index
    %c11_230 = arith.constant 11 : index
    %c0_231 = arith.constant 0 : index
    %455 = vector.load %arg6[%c2_229, %c11_230, %c0_231] : memref<3x12x128xf32, #tpu.memory_space<vmem>>, vector<1x1x128xf32>
    %456 = vector.shape_cast %455 : vector<1x1x128xf32> to vector<1x128xf32>
    %457 = vector.broadcast %4 : vector<1x128xf32> to vector<8x128xf32>
    %458 = arith.mulf %452, %457 : vector<8x128xf32>
    %cst_232 = arith.constant dense<0.000000e+00> : vector<8xf32>
    %459 = vector.multi_reduction <add>, %458, %cst_232 [1] : vector<8x128xf32> to vector<8xf32>
    %460 = vector.shape_cast %459 : vector<8xf32> to vector<8x1xf32>
    %cst_233 = arith.constant 3.125000e-02 : f32
    %461 = vector.broadcast %cst_233 : f32 to vector<8x1xf32>
    %462 = arith.mulf %460, %461 : vector<8x1xf32>
    %463 = vector.broadcast %462 : vector<8x1xf32> to vector<8x128xf32>
    %464 = arith.subf %452, %463 : vector<8x128xf32>
    %465 = vector.broadcast %4 : vector<1x128xf32> to vector<8x128xf32>
    %466 = arith.mulf %464, %465 : vector<8x128xf32>
    %467 = arith.mulf %466, %466 : vector<8x128xf32>
    %cst_234 = arith.constant dense<0.000000e+00> : vector<8xf32>
    %468 = vector.multi_reduction <add>, %467, %cst_234 [1] : vector<8x128xf32> to vector<8xf32>
    %469 = vector.shape_cast %468 : vector<8xf32> to vector<8x1xf32>
    %cst_235 = arith.constant 3.125000e-02 : f32
    %470 = vector.broadcast %cst_235 : f32 to vector<8x1xf32>
    %471 = arith.mulf %469, %470 : vector<8x1xf32>
    %cst_236 = arith.constant 9.99999974E-6 : f32
    %472 = vector.broadcast %cst_236 : f32 to vector<8x1xf32>
    %473 = arith.addf %471, %472 : vector<8x1xf32>
    %474 = math.rsqrt %473 : vector<8x1xf32>
    %475 = vector.broadcast %474 : vector<8x1xf32> to vector<8x128xf32>
    %476 = arith.mulf %466, %475 : vector<8x128xf32>
    %477 = vector.broadcast %454 : vector<1x128xf32> to vector<8x128xf32>
    %478 = arith.mulf %476, %477 : vector<8x128xf32>
    %479 = vector.broadcast %456 : vector<1x128xf32> to vector<8x128xf32>
    %480 = arith.addf %478, %479 : vector<8x128xf32>
    %c0_237 = arith.constant 0 : index
    %c0_238 = arith.constant 0 : index
    %c0_239 = arith.constant 0 : index
    %481 = vector.load %arg9[%c0_237, %c0_238, %c0_239] : memref<1x8x128xf32, #tpu.memory_space<vmem>>, vector<1x8x128xf32>
    %482 = vector.shape_cast %481 : vector<1x8x128xf32> to vector<8x128xf32>
    %483 = vector.shape_cast %480 : vector<8x128xf32> to vector<1x8x128xf32>
    tpu.vector_store %arg9[%c0_237, %c0_238, %c0_239], %483 {strides = array<i32>} : memref<1x8x128xf32, #tpu.memory_space<vmem>>, vector<1x8x128xf32>,
    return
  }
  func.func @transform_0(%arg0: i32, %arg1: i32, %arg2: memref<7xf32, #tpu.memory_space<smem>>) -> (i32, i32, i32) {
    %c0_i32 = arith.constant 0 : i32
    %c0_i32_0 = arith.constant 0 : i32
    return %arg0, %arg1, %c0_i32 : i32, i32, i32
  }
  func.func @transform_1(%arg0: i32, %arg1: i32, %arg2: memref<7xf32, #tpu.memory_space<smem>>) -> (i32, i32, i32) {
    %c0_i32 = arith.constant 0 : i32
    %c0_i32_0 = arith.constant 0 : i32
    return %arg0, %arg1, %c0_i32 : i32, i32, i32
  }
  func.func @transform_2(%arg0: i32, %arg1: i32, %arg2: memref<7xf32, #tpu.memory_space<smem>>) -> (i32, i32, i32) {
    %c0_i32 = arith.constant 0 : i32
    %c0_i32_0 = arith.constant 0 : i32
    return %arg0, %arg1, %c0_i32 : i32, i32, i32
  }
  func.func @transform_3(%arg0: i32, %arg1: i32, %arg2: memref<7xf32, #tpu.memory_space<smem>>) -> (i32, i32, i32) {
    %c0_i32 = arith.constant 0 : i32
    %c0_i32_0 = arith.constant 0 : i32
    %c0_i32_1 = arith.constant 0 : i32
    %c0_i32_2 = arith.constant 0 : i32
    return %c0_i32, %c0_i32_0, %c0_i32_1 : i32, i32, i32
  }
  func.func @transform_4(%arg0: i32, %arg1: i32, %arg2: memref<7xf32, #tpu.memory_space<smem>>) -> (i32, i32, i32, i32) {
    %c0_i32 = arith.constant 0 : i32
    %c0_i32_0 = arith.constant 0 : i32
    %c0_i32_1 = arith.constant 0 : i32
    %c0_i32_2 = arith.constant 0 : i32
    %c0_i32_3 = arith.constant 0 : i32
    return %c0_i32, %c0_i32_0, %c0_i32_1, %c0_i32_2 : i32, i32, i32, i32
  }
  func.func @transform_5(%arg0: i32, %arg1: i32, %arg2: memref<7xf32, #tpu.memory_space<smem>>) -> (i32, i32, i32, i32) {
    %c0_i32 = arith.constant 0 : i32
    %c0_i32_0 = arith.constant 0 : i32
    %c0_i32_1 = arith.constant 0 : i32
    %c0_i32_2 = arith.constant 0 : i32
    %c0_i32_3 = arith.constant 0 : i32
    return %c0_i32, %c0_i32_0, %c0_i32_1, %c0_i32_2 : i32, i32, i32, i32
  }
  func.func @transform_6(%arg0: i32, %arg1: i32, %arg2: memref<7xf32, #tpu.memory_space<smem>>) -> (i32, i32, i32) {
    %c0_i32 = arith.constant 0 : i32
    %c0_i32_0 = arith.constant 0 : i32
    return %arg0, %arg1, %c0_i32 : i32, i32, i32
  }
}

</mosaic_0001>

<bundles_post_ra>
// kernel: tpu_custom_call.1
= control target key start
LH: loop header
LB: loop body
LE: loop exit
PB: predicated region body
PF: predicated region fallthrough
CT: control target
= control target key end

     0   :  { %s3257_s24 = smov [#allocation3]   ;;  %s3698_s0 = inlined_call_operand.hbm [shape: f32[7], index: 0, kind: input, shape index: {}]   ;;  %s3699_s1 = inlined_call_operand.hbm [shape: bf16[2,8,128], index: 1, kind: input, shape index: {}]   ;;  %s3700_s2 = inlined_call_operand.hbm [shape: bf16[2,8,128], index: 2, kind: input, shape index: {}]   ;;  %s3701_s3 = inlined_call_operand.hbm [shape: bf16[2,8,128], index: 3, kind: input, shape index: {}]   ;;  %s3702_s4 = inlined_call_operand.hbm [shape: f32[3,12,128], index: 4, kind: input, shape index: {}]   ;;  %s3703_s5 = inlined_call_operand.hbm [shape: bf16[3,2,128,128], index: 5, kind: input, shape index: {}]   ;;  %s3704_s6 = inlined_call_operand.hbm [shape: bf16[3,2,128,128], index: 6, kind: input, shape index: {}]   ;;  %s3705_s7 = inlined_call_operand.hbm [shape: f32[2,8,128], index: 7, kind: output, shape index: {}]  }
   0x1   :  { %3717 = sst [smem:[#allocation26_spill]] %s3700_s2 }
   0x2   :  { %3718 = sst [smem:[#allocation27_spill]] %s3702_s4 }
   0x3   :  { %3719 = sst [smem:[#allocation28_spill]] %s3703_s5 }
   0x4   :  { %13 = dma.hbm_to_smem %s3698_s0, 16, %s3257_s24, [#allocation2] }
   0x5   :  { %3211 = dma.done.wait [#allocation2], 16 }
   0x6   :  { %3212 = vsyncadd [#allocation2], 4294967280 }
   0x7   :  { %15 = sfence }
   0x8   :  { %16 = vsyncpa [#allocation5], 0 }
   0x9   :  { %18 = vsyncpa [#allocation5 + $0x1], 0 }
   0xa   :  { %19 = vsyncpa [#allocation8], 0 }
   0xb   :  { %21 = vsyncpa [#allocation8 + $0x1], 0 }
   0xc   :  { %22 = vsyncpa [#allocation11], 0 }
   0xd   :  { %23 = vsyncpa [#allocation14], 0 }
   0xe   :  { %24 = vsyncpa [#allocation6], 0 }
   0xf   :  { %26 = vsyncpa [#allocation6 + $0x1], 0  ;;  %s3314_s27 = smov 0   ;;  %s3316_s28 = smov 0  }
  0x10   :  { %s3318_s29 = smov 0   ;;  %s3320_s30 = smov 0  }
  0x11   :  { %s3322_s0 = smov 0   ;;  %s3324_s8 = smov 0  }
  0x12 LB: > { %3720 = sst [smem:[#allocation22_spill]] %s3251_s0  ;;  %s3345_s9 = sadd.s32 4294967295, %s3255_s8   ;;  %s3255_s8 = sphi %s3324_s8, %s32_s8   ;;  %s3251_s0 = sphi %s3322_s0, %s3751_s0   ;;  %s3247_s30 = sphi %s3320_s30, %s3750_s30   ;;  %s3243_s29 = sphi %s3318_s29, %s3754_s29   ;;  %s3239_s28 = sphi %s3316_s28, %s3753_s28   ;;  %s3235_s27 = sphi %s3314_s27, %s3752_s27  }
  0x13   : > { %3721 = sst [smem:[#allocation23_spill]] %s3255_s8  ;;  %s2246_s10 = sadd.s32 4294967294, %s3255_s8  }
  0x14   : > { %p66_p0 = scmp.ne.s32.totalorder %s3239_s28, %s3235_s27  ;;  %p3711_p1 = scmp.eq.s32.totalorder %s3345_s9, 0 }
  0x15   : > { %p217_p3 = scmp.eq.s32.totalorder %s2246_s10, 1  ;;  %p2247_p5 = scmp.ge.s32.totalorder %s3255_s8, 1 }
  0x16   : > { %p3354_p4 = por %p3711_p1, %p66_p0  ;;  %p224_p7 = scmp.lt.s32.totalorder %s3255_s8, 3 }
  0x17   : > { %p3359_p6 = por %p217_p3, %p66_p0  ;;  %s3258_s14 = smov [#allocation10]  }
  0x18   : > { %s3722_s11 = scalar_select %p3354_p4, 1, 0 }
  0x19   : > { %s3723_s12 = scalar_select %p3359_p6, 1, 0 }
  0x1a   : > { %p3364_p8 = pnand %p2247_p5, %p224_p7  ;;  %s236_s15 = sshll.u32 %s3258_s14, 4  ;;  %s237_s15 = int_to_ptr.vmem [resolvable:$true] %s236_s15 }
  0x1b   : > { %s44_s17 = sadd.s32 1, %s3251_s0  ;;  %s3010_s18 = scalar_lea.vmem %s237_s15, 768 }
  0x1c   : > { %s3724_s13 = scalar_select %p3364_p8, 1, 0 }
  0x1d   : > { %p2777_p9 = pneg %p3364_p8  ;;  %p3011_p13 = scmp.ne.s32.totalorder %s237_s15, %s3010_s18 }
  0x1e   : > { %p3018_p5 = scmp.lt.s32.totalorder %s237_s15, %s237_s15  ;;  %p3019_p7 = scmp.lt.s32.totalorder %s3010_s18, %s3010_s18 }
  0x1f   : > { %p3373_p11 = pnand %p2777_p9, %p3711_p1 }
  0x20   : > { %p3020_p2 = por %p3019_p7, %p3018_p5 }
  0x21   : > { %p3712_p12 = pneg %p3373_p11 }
  0x23   : > { %p3013_p0 = pnand %p3011_p13, %p3712_p12 }
  0x25   : > { %p3014_p3 = pneg %p3013_p0 }
  0x27   : > { %p3021_p10 = pnand %p3020_p2, %p3014_p3 }
  0x29   : > { %3024 = shalt.err (!%p3021_p10)
}
  0x2a   : > { %s3259_s19 = smov 128   ;;  %s3260_s20 = smov 8  }
  0x2b   : > { %s3726_s4 = sld [smem:[#allocation27_spill]]  ;;  %p46_p2 = scmp.ge.s32.totalorder %s44_s17, 2 }
  0x2c   : > { %s53_s23 = sadd.s32 1, %s3243_s29  ;;  %p60_p9 = scmp.ne.s32.totalorder %s3243_s29, %s3239_s28 }
  0x2d   : > { %p61_p10 = scmp.eq.s32.totalorder %s3255_s8, 0  ;;  %s3756_s17 = smov (%p46_p2, %s44_s17), 0 }
  0x2e   : > { %3727 = sst [smem:[#allocation24_spill]] %s3756_s17  ;;  %p3728_p0 = scmp.eq.s32.totalorder %s3345_s9, 1 }
  0x2f   : > { %p62_p13 = por %p61_p10, %p60_p9  ;;  %s48_s25 = ssub.s32 %s3251_s0, %s3756_s17 }
  0x30   : > { %p3396_p3 = por %p3728_p0, %p60_p9  ;;  %p2804_p5 = scmp.lt.s32.totalorder %s3255_s8, 2 }
  0x31   : > { %2780 = dma.hbm_to_vmem [thread:$0]  (!%p3373_p11), %s3726_s4, 768, %s237_s15, [#allocation11], %s3259_s19, %s3259_s19, %s3260_s20  }
  0x32   : > { %s3729_s24 = scalar_select %p3396_p3, 1, 0 }
  0x33   : > { %p51_p7 = scmp.eq.s32.totalorder %s48_s25, 0  ;;  %s3706_s26 = sand.u32 1, %s3243_s29  }
  0x34   : > { %s3406_s10 = sshll.u32 %s3706_s26, 2  ;;  %s3409_s14 = sshll.u32 %s3251_s0, 6 }
  0x35   : > { %s3412_s15 = scalar_select %p51_p7, %s3243_s29, %s53_s23  }
  0x36   : > { %p3414_p2 = pnand %p2804_p5, %p62_p13  ;;  %s295_s19 = sand.u32 1, %s3255_s8  }
  0x37   : > { %3730 = sst [smem:[#allocation25_spill]] %s3412_s15  ;;  %s299_s25 = scalar_lea.vmem [#allocation7], %s3406_s10 }
  0x38   : > { %s3732_s2 = sld [smem:[#allocation26_spill]]  ;;  %s307_s26 = sshll.u32 %s299_s25, 4  ;;  %s308_s26 = int_to_ptr.vmem [resolvable:$true] %s307_s26 }
  0x39   : > { %s3261_s4 = smov [#allocation12]   ;;  %s3424_s0 = scalar_lea.sflag [#allocation8], %s295_s19 }
  0x3a   : > { %s249_s17 = sshll.u32 %s3261_s4, 4  ;;  %p3713_p9 = pneg %p3414_p2  ;;  %s250_s17 = int_to_ptr.vmem [resolvable:$true] %s249_s17 }
  0x3b   : > { %s3038_s23 = scalar_lea.vmem %s308_s26, 64  ;;  %s3262_s15 = smov [#allocation7]  }
  0x3c   : > { %p3039_p10 = scmp.ne.s32.totalorder %s308_s26, %s3038_s23  ;;  %s3043_s8 = sshll.u32 %s3262_s15, 4  ;;  %s3044_s8 = int_to_ptr.vmem [resolvable:$false] %s3043_s8 }
  0x3d   : > { %s3045_s20 = scalar_lea.vmem %s3044_s8, 128  ;;  %p3046_p5 = scmp.lt.s32.totalorder %s308_s26, %s3044_s8 }
  0x3e   : > { %s305_s22 = scalar_lea.hbm %s3732_s2, %s3409_s14  ;;  %p3041_p13 = pnand %p3039_p10, %p3713_p9 }
  0x3f   : > { %p3047_p7 = scmp.lt.s32.totalorder %s3045_s20, %s3038_s23 }
  0x40   : > { %p3042_p0 = pneg %p3041_p13 }
  0x41   : > { %p3048_p1 = por %p3047_p7, %p3046_p5 }
  0x43   : > { %p3049_p12 = pnand %p3048_p1, %p3042_p0 }
  0x45   : > { %3052 = shalt.err (!%p3049_p12)
}
  0x46   : > { %2793 = dma.hbm_to_vmem [thread:$0]  (!%p3414_p2), %s305_s22, 64, %s308_s26, %s3424_s0  }
  0x47   : > { %s3064_s4 = scalar_lea.vmem %s250_s17, 6144  ;;  %p3733_p10 = pneg %p3373_p11 }
  0x48   : > { %p3065_p6 = scmp.ne.s32.totalorder %s250_s17, %s3064_s4  ;;  %p3072_p3 = scmp.lt.s32.totalorder %s250_s17, %s250_s17 }
  0x49   : > { %p3073_p4 = scmp.lt.s32.totalorder %s3064_s4, %s3064_s4 }
  0x4a   : > { %p3067_p13 = pnand %p3065_p6, %p3733_p10 }
  0x4b   : > { %p3074_p8 = por %p3073_p4, %p3072_p3 }
  0x4c   : > { %p3068_p9 = pneg %p3067_p13 }
  0x4e   : > { %p3075_p5 = pnand %p3074_p8, %p3068_p9 }
  0x50   : > { %3078 = shalt.err (!%p3075_p5)
}
  0x51   : > { %s3263_s8 = smov 64   ;;  %s3264_s15 = smov 4  }
  0x52   : > { %s3734_s5 = sld [smem:[#allocation28_spill]]  ;;  %s3265_s26 = smov [#allocation13]  }
  0x53   : > { %s262_s22 = sshll.u32 %s3265_s26, 4  ;;  %p3735_p6 = pmov %p3733_p10  ;;  %s263_s22 = int_to_ptr.vmem [resolvable:$true] %s262_s22 }
  0x54   : > { %s3090_s25 = scalar_lea.vmem %s263_s22, 6144  ;;  %p3098_p8 = scmp.lt.s32.totalorder %s263_s22, %s263_s22 }
  0x55   : > { %p3091_p1 = scmp.ne.s32.totalorder %s263_s22, %s3090_s25  ;;  %p3099_p3 = scmp.lt.s32.totalorder %s3090_s25, %s3090_s25 }
  0x57   : > { %p3093_p12 = pnand %p3091_p1, %p3735_p6  ;;  %p3100_p9 = por %p3099_p3, %p3098_p8 }
  0x58   : > { %2783 = dma.hbm_to_vmem [thread:$0]  (!%p3373_p11), %s3734_s5, 6144, %s250_s17, [#allocation11], %s3263_s8, %s3263_s8, %s3264_s15  }
  0x59   : > { %p3094_p4 = pneg %p3093_p12 }
  0x5b   : > { %p3101_p0 = pnand %p3100_p9, %p3094_p4 }
  0x5d   : > { %3104 = shalt.err (!%p3101_p0)
}
  0x5e   : > { %2786 = dma.hbm_to_vmem [thread:$0]  (!%p3373_p11), %s3704_s6, 6144, %s263_s22, [#allocation14], %s3263_s8, %s3263_s8, %s3264_s15  }
  0x5f   : > { %s286_s19 = scalar_lea.hbm %s3699_s1, %s3409_s14  ;;  %s280_s21 = scalar_lea.vmem [#allocation4], %s3406_s10 }
  0x60   : > { %s288_s26 = sshll.u32 %s280_s21, 4  ;;  %s3736_s25 = sand.u32 1, %s3243_s29   ;;  %s289_s26 = int_to_ptr.vmem [resolvable:$true] %s288_s26 }
  0x61   : > { %s277_s2 = scalar_lea.sflag [#allocation5], %s3736_s25  ;;  %s3118_s5 = scalar_lea.vmem %s289_s26, 64 }
  0x62   : > { %p3119_p7 = scmp.ne.s32.totalorder %s289_s26, %s3118_s5  ;;  %p3737_p10 = pneg %p3414_p2 }
  0x63   : > { %s3266_s16 = smov [#allocation4]  }
  0x64   : > { %p3121_p13 = pnand %p3119_p7, %p3737_p10  ;;  %s3123_s23 = sshll.u32 %s3266_s16, 4  ;;  %s3124_s23 = int_to_ptr.vmem [resolvable:$false] %s3123_s23 }
  0x65   : > { %s3125_s20 = scalar_lea.vmem %s3124_s23, 128  ;;  %p3126_p11 = scmp.lt.s32.totalorder %s289_s26, %s3124_s23 }
  0x66   : > { %p3122_p5 = pneg %p3121_p13  ;;  %p3127_p1 = scmp.lt.s32.totalorder %s3125_s20, %s3118_s5 }
  0x68   : > { %p3128_p6 = por %p3127_p1, %p3126_p11 }
  0x6a   : > { %p3129_p12 = pnand %p3128_p6, %p3122_p5 }
  0x6c   : > { %3132 = shalt.err (!%p3129_p12)
}
  0x6d   : > { %2790 = dma.hbm_to_vmem [thread:$0]  (!%p3414_p2), %s286_s19, 64, %s289_s26, %s277_s2  }
  0x6e   : > { %s324_s22 = scalar_lea.hbm %s3701_s3, %s3409_s14  ;;  %s318_s17 = scalar_lea.vmem [#allocation9], %s3406_s10 }
  0x6f   : > { %s326_s4 = sshll.u32 %s318_s17, 4  ;;  %p3738_p8 = pmov %p3737_p10  ;;  %s327_s4 = int_to_ptr.vmem [resolvable:$true] %s326_s4 }
  0x70   : > { %s3146_s21 = scalar_lea.vmem %s327_s4, 64  ;;  %s3267_s5 = smov [#allocation9]  }
  0x71   : > { %p3147_p4 = scmp.ne.s32.totalorder %s327_s4, %s3146_s21  ;;  %s3151_s25 = sshll.u32 %s3267_s5, 4  ;;  %s3152_s25 = int_to_ptr.vmem [resolvable:$false] %s3151_s25 }
  0x72   : > { %s3153_s16 = scalar_lea.vmem %s3152_s25, 128  ;;  %p3154_p0 = scmp.lt.s32.totalorder %s327_s4, %s3152_s25 }
  0x73   : > { %p3149_p3 = pnand %p3147_p4, %p3738_p8  ;;  %p3155_p7 = scmp.lt.s32.totalorder %s3153_s16, %s3146_s21 }
  0x75   : > { %p3150_p9 = pneg %p3149_p3  ;;  %p3156_p10 = por %p3155_p7, %p3154_p0 }
  0x77   : > { %p3157_p13 = pnand %p3156_p10, %p3150_p9 }
  0x79   : > { %3160 = shalt.err (!%p3157_p13)
}
  0x7a   : > { %2796 = dma.hbm_to_vmem [thread:$0]  (!%p3414_p2), %s324_s22, 64, %s327_s4, %s3424_s0  }
  0x7b   : > { %p3739_p5 = scmp.ne.s32.totalorder %s3724_s13, 0 }
  0x7c   : > { %s3476_s2 = sand.u32 (!%p3739_p5), 1, %s3239_s28   ;;  %p3740_p11 = scmp.ne.s32.totalorder (!%p3739_p5), %s3722_s11, 0 }
  0x7d   : > { %335 = sbr.rel (%p3739_p5) target bundleno = 2662 (0xa66), region = 44  ;;  %s2259_s10 = sshll.u32 (!%p3739_p5), %s3476_s2, 2 }
  0x7e   : > { %s338_s14 = scalar_lea.sflag (!%p3739_p5), [#allocation5], %s3476_s2  ;;  %s341_s19 = scalar_lea.vmem (!%p3739_p5), [#allocation4], %s2259_s10 }
  0x82   : > { %3214 = dma.done.wait (%p3740_p11), %s338_s14, 64  }
  0x83   : > { %3216 = vsyncadd (%p3740_p11), %s338_s14, 4294967232  ;;  %s346_s0 = sand.u32 1, %s3345_s9   ;;  %s350_s13 = scalar_lea.vmem [#allocation7], %s2259_s10 }
  0x84   : > { %s347_s18 = scalar_lea.sflag [#allocation8], %s346_s0 }
  0x85   : > { %3218 = dma.done.wait (%p3740_p11), %s347_s18, 128  }
  0x86   : > { %3220 = vsyncadd (%p3740_p11), %s347_s18, 4294967168  ;;  %s359_s26 = scalar_lea.vmem [#allocation9], %s2259_s10  ;;  %p3741_p2 = scmp.eq.s32.totalorder %s3345_s9, 0 }
  0x88   : > { %3222 = dma.done.wait (%p3741_p2), [#allocation11], 6912   ;;  %p3742_p1 = pmov %p3741_p2 }
  0x8a   : > { %3224 = vsyncadd (%p3742_p1), [#allocation11], 4294960384  ;;  %p3743_p6 = pmov %p3742_p1 }
  0x8b   : > { %p3744_p12 = pmov %p3742_p1 }
  0x8c   : > { %3226 = dma.done.wait (%p3743_p6), [#allocation14], 6144  }
  0x8d   : > { %3228 = vsyncadd (%p3744_p12), [#allocation14], 4294961152  ;;  %v411_v0 = vlaneseq  ;;  %v3268_v1 = vmov 0.0   ;;  %v416_v4 = vld [vmem:[%s341_s19] sm:$0xf]  ;;  %v2868_v14 = vld [vmem:[#allocation12 + $0x30] sm:$0xff]  }
  0x8e   : > { %2517 = vmatprep.subr.bf16.mxu0 %v3268_v1  ;;  %2537 = vmatprep.subr.bf16.mxu1 %v3268_v1  ;;  %v418_v5 = vld [vmem:[%s350_s13] sm:$0xf]  ;;  %v420_v6 = vld [vmem:[%s359_s26] sm:$0xf]  ;;  %v417_v7 = vunpack.c.l.bf16 %v416_v4  ;;  %v2867_v13 = vld [vmem:[#allocation12 + $0x38] sm:$0xff]   ;;  %vm3269_vm1 = vmmov 0  }
  0x8f   : > { %v412_v2 = vand.u32 127, %v411_v0  ;;  %v419_v8 = vunpack.c.l.bf16 %v418_v5  ;;  %v421_v9 = vunpack.c.l.bf16 %v420_v6  ;;  %2518 = vmatpush3.bf16.msra.mxu0 %v2867_v13  ;;  %v2869_v30 = vld [vmem:[#allocation12 + $0x28] sm:$0xff]   ;;  %v2870_v31 = vld [vmem:[#allocation12 + $0x20] sm:$0xff]   ;;  %v2871_v32 = vld [vmem:[#allocation12 + $0x18] sm:$0xff]   ;;  %2533 = vmatprep.mubr.msk.bf16.mxu0 %vm3269_vm1, %v3268_v1  ;;  %s2267_s9 = sld [smem:[#allocation3 + $0x4]]  ;;  %s976_s20 = sadd.s32 2, %s3247_s30 }
  0x90   : > { %2519 = vmatprep.subr.bf16.mxu0 %v3268_v1  ;;  %2553 = vmatprep.mubr.msk.bf16.mxu1 %vm3269_vm1, %v3268_v1  ;;  %v2872_v33 = vld [vmem:[#allocation12 + $0x10] sm:$0xff]   ;;  %v2873_v34 = vld [vmem:[#allocation12 + $0x8] sm:$0xff]   ;;  %v2874_v35 = vld [vmem:[#allocation12] sm:$0xff]   ;;  %s422_s11 = sld [smem:[#allocation3 + %s3247_s30]]  ;;  %s2265_s22 = sshll.u32 %s3476_s2, 3 }
  0x91   : > { %vm413_vm0 = vcmp.lt.s32.totalorder %v412_v2, 32  ;;  %v2899_v36 = vld [vmem:[#allocation13 + $0x38] sm:$0xff]   ;;  %v2900_v37 = vld [vmem:[#allocation13 + $0x30] sm:$0xff]   ;;  %v2901_v40 = vld [vmem:[#allocation13 + $0x28] sm:$0xff]   ;;  %s2313_s23 = sld [smem:[#allocation3 + $0x5]]  ;;  %s2406_s17 = sshll.u32 %s3247_s30, 7 }
  0x92   : > { %v3500_v3 = vsel %vm413_vm0, 1.0, %v3268_v1  ;;  %2538 = vmatpush3.bf16.msra.mxu1 %v2899_v36  ;;  %v2902_v42 = vld [vmem:[#allocation13 + $0x20] sm:$0xff]   ;;  %v2903_v43 = vld [vmem:[#allocation13 + $0x18] sm:$0xff]   ;;  %v2904_v44 = vld [vmem:[#allocation13 + $0x10] sm:$0xff]   ;;  %s977_s8 = sld [smem:[#allocation3 + %s976_s20]]  ;;  %s409_s4 = scalar_lea.vmem [#allocation15], %s2265_s22 }
  0x93   : > { %v426_v10 = vmul.f32 %v3500_v3, %v417_v7  ;;  %v982_v11 = vmul.f32 %v3500_v3, %v419_v8  ;;  %v672_v12 = vmul.f32 %v3500_v3, %v421_v9  ;;  %2520 = vmatpush3.bf16.msra.mxu0 %v2868_v14  ;;  %2539 = vmatprep.subr.bf16.mxu1 %v3268_v1  ;;  %v2905_v45 = vld [vmem:[#allocation13 + $0x8] sm:$0xff]   ;;  %v2268_v48 = vld [vmem:[#allocation10] ss:$0 sm:$0xff]  ;;  %v2269_v50 = vld [vmem:[#allocation10 + $0x1] ss:$0 sm:$0xff]  ;;  %s2359_s15 = sld [smem:[#allocation3 + $0x6]]  ;;  %s2089_s16 = scalar_lea.hbm %s3705_s7, %s2406_s17 }
  0x94   : > { %2521 = vmatprep.subr.bf16.mxu0 %v3268_v1  ;;  %v2875_v54 = vld [vmem:[#allocation12 + $0x78] sm:$0xff]   ;;  %v2876_v57 = vld [vmem:[#allocation12 + $0x70] sm:$0xff]   ;;  %v2877_v58 = vld [vmem:[#allocation12 + $0x68] sm:$0xff]   ;;  %s2091_s21 = sshll.u32 %s409_s4, 4  ;;  %s2077_s10 = scalar_lea.sflag [#allocation6], %s3476_s2  ;;  %s2092_s21 = int_to_ptr.vmem [resolvable:$true] %s2091_s21 }
  0x95   : > { %427 = vadd.xlane.f32.xlu0 %v426_v10  ;;  %983 = vadd.xlane.f32.xlu1 %v982_v11  ;;  %v2878_v59 = vld [vmem:[#allocation12 + $0x60] sm:$0xff]   ;;  %v2879_v60 = vld [vmem:[#allocation12 + $0x58] sm:$0xff]   ;;  %v2880_v62 = vld [vmem:[#allocation12 + $0x50] sm:$0xff]   ;;  %s3161_s14 = scalar_lea.vmem %s2092_s21, 128  ;;  %p3745_p8 = scmp.ne.s32.totalorder %s3729_s24, 0 }
  0x96   : > { %2540 = vmatpush3.bf16.msra.mxu1 %v2900_v37  ;;  %v2288_v0 = vld [vmem:[#allocation10 + $0x4] ss:$0 sm:$0xff]  ;;  %v2881_v2 = vld [vmem:[#allocation12 + $0x48] sm:$0xff]   ;;  %v2289_v6 = vld [vmem:[#allocation10 + $0x5] ss:$0 sm:$0xff]  ;;  %p3162_p4 = scmp.ne.s32.totalorder %s2092_s21, %s3161_s14  ;;  %s3270_s19 = smov [#allocation15]  }
  0x97   : > { %2522 = vmatpush3.bf16.msra.mxu0 %v2869_v30  ;;  %2541 = vmatprep.subr.bf16.mxu1 %v3268_v1  ;;  %v2883_v10 = vld [vmem:[#allocation12 + $0xb8] sm:$0xff]   ;;  %v2884_v13 = vld [vmem:[#allocation12 + $0xb0] sm:$0xff]   ;;  %v2885_v14 = vld [vmem:[#allocation12 + $0xa8] sm:$0xff]   ;;  %s3165_s0 = sshll.u32 %s3270_s19, 4  ;;  %s3166_s0 = int_to_ptr.vmem [resolvable:$false] %s3165_s0 }
  0x98   : > { %2523 = vmatprep.subr.bf16.mxu0 %v3268_v1  ;;  %v2893_v30 = vld [vmem:[#allocation12 + $0xe8] sm:$0xff]   ;;  %v2335_v37 = vld [vmem:[#allocation10 + $0x15] ss:$0 sm:$0xff]  ;;  %p3163_p3 = pnand %p3162_p4, %p3745_p8  ;;  %s3167_s30 = scalar_lea.vmem %s3166_s0, 256 }
  0x99   : > { %673 = vadd.xlane.f32.xlu0 %v672_v12  ;;  %p3168_p0 = scmp.lt.s32.totalorder %s2092_s21, %s3166_s0  ;;  %p3169_p7 = scmp.lt.s32.totalorder %s3167_s30, %s3161_s14 }
  0x9a   : > { %2542 = vmatpush3.bf16.msra.mxu1 %v2901_v40  ;;  %p3164_p9 = pneg %p3163_p3 }
  0x9b   : > { %2524 = vmatpush3.bf16.msra.mxu0 %v2870_v31  ;;  %2543 = vmatprep.subr.bf16.mxu1 %v3268_v1  ;;  %v2894_v31 = vld [vmem:[#allocation12 + $0xe0] sm:$0xff]   ;;  %p3170_p10 = por %p3169_p7, %p3168_p0 }
  0x9c   : > { %2525 = vmatprep.subr.bf16.mxu0 %v3268_v1 }
  0x9d   : > { %p3171_p13 = pnand %p3170_p10, %p3164_p9 }
  0x9e   : > { %2544 = vmatpush3.bf16.msra.mxu1 %v2902_v42 }
  0x9f   : > { %2526 = vmatpush3.bf16.msra.mxu0 %v2871_v32  ;;  %2545 = vmatprep.subr.bf16.mxu1 %v3268_v1  ;;  %v2895_v32 = vld [vmem:[#allocation12 + $0xd8] sm:$0xff]  }
  0xa0   : > { %2527 = vmatprep.subr.bf16.mxu0 %v3268_v1 }
  0xa2   : > { %2546 = vmatpush3.bf16.msra.mxu1 %v2903_v43 }
  0xa3   : > { %2528 = vmatpush3.bf16.msra.mxu0 %v2872_v33  ;;  %2547 = vmatprep.subr.bf16.mxu1 %v3268_v1  ;;  %v2896_v33 = vld [vmem:[#allocation12 + $0xd0] sm:$0xff]  }
  0xa4   : > { %2529 = vmatprep.subr.bf16.mxu0 %v3268_v1 }
  0xa6   : > { %2548 = vmatpush3.bf16.msra.mxu1 %v2904_v44 }
  0xa7   : > { %2530 = vmatpush3.bf16.msra.mxu0 %v2873_v34  ;;  %2549 = vmatprep.subr.bf16.mxu1 %v3268_v1  ;;  %v2334_v34 = vld [vmem:[#allocation10 + $0x14] ss:$0 sm:$0xff] }
  0xa8   : > { %2531 = vmatprep.subr.bf16.mxu0 %v3268_v1 }
  0xaa   : > { %2550 = vmatpush3.bf16.msra.mxu1 %v2905_v45 }
  0xab   : > { %2532 = vmatpush3.bf16.msra.mxu0 %v2874_v35  ;;  %2551 = vmatprep.subr.bf16.mxu1 %v3268_v1  ;;  %v2897_v35 = vld [vmem:[#allocation12 + $0xc8] sm:$0xff]  }
  0xac   : > { %2557 = vmatprep.subr.bf16.mxu0 %v3268_v1 }
 0x11e   : > { %v428_v15 = vpop.xlane.xlu0 %427  ;;  %v984_v16 = vpop.xlane.xlu1 %983 }
 0x11f   : > { %v429_v17 = vmul.f32 0.03125, %v428_v15  ;;  %v985_v18 = vmul.f32 0.03125, %v984_v16  ;;  %v2886_v15 = vld [vmem:[#allocation12 + $0xa0] sm:$0xff]   ;;  %v2887_v16 = vld [vmem:[#allocation12 + $0x98] sm:$0xff]  }
 0x121   : > { %v430_v19 = vsub.f32 %v417_v7, %v429_v17  ;;  %v986_v20 = vsub.f32 %v419_v8, %v985_v18  ;;  %v2882_v7 = vld [vmem:[#allocation12 + $0x40] sm:$0xff]   ;;  %v2888_v18 = vld [vmem:[#allocation12 + $0x90] sm:$0xff]  }
 0x122   : > { %v674_v21 = vpop.xlane.xlu0 %673 }
 0x123   : > { %v675_v22 = vmul.f32 0.03125, %v674_v21  ;;  %v431_v23 = vmul.f32 %v3500_v3, %v430_v19  ;;  %v3509_v24 = vmul.f32 %v3500_v3, %v986_v20  ;;  %v2314_v20 = vld [vmem:[#allocation10 + $0x10] ss:$0 sm:$0xff]  ;;  %v2889_v21 = vld [vmem:[#allocation12 + $0x88] sm:$0xff]  }
 0x125   : > { %v676_v25 = vsub.f32 %v421_v9, %v675_v22  ;;  %v432_v26 = vmul.f32 %v431_v23, %v431_v23  ;;  %v988_v27 = vmul.f32 %v3509_v24, %v3509_v24 }
 0x127   : > { %433 = vadd.xlane.f32.xlu1 %v432_v26  ;;  %v3514_v28 = vmul.f32 %v3500_v3, %v676_v25  ;;  %v2890_v25 = vld [vmem:[#allocation12 + $0x80] sm:$0xff]  }
 0x129   : > { %v678_v29 = vmul.f32 %v3514_v28, %v3514_v28 }
 0x12b   : > { %989 = vadd.xlane.f32.xlu1 %v988_v27  ;;  %679 = vadd.xlane.f32.xlu0 %v678_v29  ;;  %v2891_v27 = vld [vmem:[#allocation12 + $0xf8] sm:$0xff]   ;;  %v2906_v29 = vld [vmem:[#allocation13] sm:$0xff]  }
 0x12c   : > { %2552 = vmatpush3.bf16.msra.mxu1 %v2906_v29 }
 0x12d   : > { %2577 = vmatprep.subr.bf16.mxu1 %v3268_v1 }
 0x1b0   : > { %v434_v38 = vpop.xlane.xlu1 %433 }
 0x1b1   : > { %v435_v39 = vmul.f32 0.03125, %v434_v38  ;;  %v2898_v38 = vld [vmem:[#allocation12 + $0xc0] sm:$0xff]  }
 0x1b3   : > { %v436_v41 = vadd.f32 1e-05, %v435_v39 }
 0x1b4   : > { %v680_v47 = vpop.xlane.xlu0 %679  ;;  %v990_v5 = vpop.xlane.xlu1 %989 }
 0x1b5   : > { %2963 = vrsqrt.f32 %v436_v41  ;;  %v681_v51 = vmul.f32 0.03125, %v680_v47  ;;  %v991_v8 = vmul.f32 0.03125, %v990_v5  ;;  %v2270_v41 = vld [vmem:[#allocation10 + $0x2] ss:$0 sm:$0xff]  ;;  %v2907_v47 = vld [vmem:[#allocation13 + $0x78] sm:$0xff]   ;;  %v2917_v5 = vld [vmem:[#allocation13 + $0xa8] sm:$0xff]  }
 0x1b7   : > { %v682_v55 = vadd.f32 1e-05, %v681_v51  ;;  %v992_v11 = vadd.f32 1e-05, %v991_v8  ;;  %v2909_v51 = vld [vmem:[#allocation13 + $0x68] sm:$0xff]   ;;  %v2920_v8 = vld [vmem:[#allocation13 + $0x90] sm:$0xff]  }
 0x1b9   : > { %2965 = vrsqrt.f32 %v682_v55  ;;  %v2913_v55 = vld [vmem:[#allocation13 + $0x48] sm:$0xff]  }
 0x1ba   : > { %2967 = vrsqrt.f32 %v992_v11 }
 0x1c2   : > { %v2964_v46 = vpop.eup %2963 }
 0x1c3   : > { %v438_v49 = vmul.f32 %v2964_v46, %v431_v23  ;;  %v2315_v23 = vld [vmem:[#allocation10 + $0x11] ss:$0 sm:$0xff] }
 0x1c5   : > { %v443_v52 = vmul.f32 %v2268_v48, %v438_v49 }
 0x1c6   : > { %v2966_v61 = vpop.eup %2965 }
 0x1c7   : > { %v448_v53 = vadd.f32 %v2269_v50, %v443_v52  ;;  %v3543_v63 = vmul.f32 %v2966_v61, %v3514_v28  ;;  %v2968_v17 = vpop.eup %2967  ;;  %v2908_v50 = vld [vmem:[#allocation13 + $0x70] sm:$0xff]   ;;  %v2910_v52 = vld [vmem:[#allocation13 + $0x60] sm:$0xff]  }
 0x1c8   : > { %v994_v19 = vmul.f32 %v2968_v17, %v3509_v24  ;;  %v2892_v24 = vld [vmem:[#allocation12 + $0xf0] sm:$0xff]   ;;  %v2923_v17 = vld [vmem:[#allocation13 + $0xf8] sm:$0xff]  }
 0x1c9   : > { %v465_v56 = vpack.c.bf16 %v448_v53, %v448_v53  ;;  %v689_v4 = vmul.f32 %v2288_v0, %v3543_v63  ;;  %v1234_v36 = vmul.f32 %v2334_v34, %v3543_v63  ;;  %v2911_v53 = vld [vmem:[#allocation13 + $0x58] sm:$0xff]  }
 0x1ca   : > { %v999_v22 = vmul.f32 %v2314_v20, %v994_v19  ;;  %v2915_v63 = vld [vmem:[#allocation13 + $0xb8] sm:$0xff]   ;;  %v2924_v20 = vld [vmem:[#allocation13 + $0xf0] sm:$0xff]  }
 0x1cb   : > { %2534 = vmatmul.mubr.bf16.vlgmr.msra.gmra.mxu0 %v465_v56  ;;  %v694_v9 = vadd.f32 %v2289_v6, %v689_v4  ;;  %v1239_v39 = vadd.f32 %v2335_v37, %v1234_v36  ;;  %v2290_v56 = vld [vmem:[#allocation10 + $0x6] ss:$0 sm:$0xff]  ;;  %v2918_v6 = vld [vmem:[#allocation13 + $0xa0] sm:$0xff]   ;;  %v2308_v37 = vld [vmem:[#allocation10 + $0x8] ss:$0 sm:$0xff] }
 0x1cc   : > { %2558 = vmatpush3.bf16.msra.mxu0 %v2875_v54  ;;  %2573 = vmatprep.mubr.msk.bf16.mxu0 %vm3269_vm1, %v3268_v1  ;;  %v1004_v26 = vadd.f32 %v2315_v23, %v999_v22  ;;  %v2912_v54 = vld [vmem:[#allocation13 + $0x50] sm:$0xff]   ;;  %v2926_v22 = vld [vmem:[#allocation13 + $0xe0] sm:$0xff]   ;;  %v2927_v23 = vld [vmem:[#allocation13 + $0xd8] sm:$0xff]  }
 0x1cd   : > { %2559 = vmatprep.subr.bf16.mxu0 %v3268_v1  ;;  %v712_v12 = vpack.c.bf16 %v694_v9, %v694_v9  ;;  %v1257_v40 = vpack.c.bf16 %v1239_v39, %v1239_v39  ;;  %v2916_v4 = vld [vmem:[#allocation13 + $0xb0] sm:$0xff]   ;;  %v2921_v9 = vld [vmem:[#allocation13 + $0x88] sm:$0xff]  }
 0x1ce   : > { %v1022_v28 = vpack.c.bf16 %v1004_v26, %v1004_v26  ;;  %v2929_v26 = vld [vmem:[#allocation13 + $0xc8] sm:$0xff]  }
 0x1d0   : > { %2560 = vmatpush3.bf16.msra.mxu0 %v2876_v57 }
 0x1d1   : > { %2561 = vmatprep.subr.bf16.mxu0 %v3268_v1 }
 0x1d4   : > { %2562 = vmatpush3.bf16.msra.mxu0 %v2877_v58  ;;  %v2914_v58 = vld [vmem:[#allocation13 + $0x40] sm:$0xff]  }
 0x1d5   : > { %2563 = vmatprep.subr.bf16.mxu0 %v3268_v1 }
 0x1d8   : > { %2564 = vmatpush3.bf16.msra.mxu0 %v2878_v59 }
 0x1d9   : > { %2565 = vmatprep.subr.bf16.mxu0 %v3268_v1 }
 0x1dc   : > { %2566 = vmatpush3.bf16.msra.mxu0 %v2879_v60 }
 0x1dd   : > { %2567 = vmatprep.subr.bf16.mxu0 %v3268_v1 }
 0x1e0   : > { %2568 = vmatpush3.bf16.msra.mxu0 %v2880_v62 }
 0x1e1   : > { %2569 = vmatprep.subr.bf16.mxu0 %v3268_v1 }
 0x1e4   : > { %2570 = vmatpush3.bf16.msra.mxu0 %v2881_v2 }
 0x1e5   : > { %2571 = vmatprep.subr.bf16.mxu0 %v3268_v1 }
 0x1e8   : > { %2572 = vmatpush3.bf16.msra.mxu0 %v2882_v7  ;;  %v2919_v7 = vld [vmem:[#allocation13 + $0x98] sm:$0xff]  }
 0x1e9   : > { %2597 = vmatprep.subr.bf16.mxu0 %v3268_v1 }
 0x1eb   : > { %2574 = vmatmul.mubr.bf16.vlgmr.msra.gmra.mxu0 %v712_v12  ;;  %v2922_v12 = vld [vmem:[#allocation13 + $0x80] sm:$0xff]  }
 0x1ec   : > { %2598 = vmatpush3.bf16.msra.mxu0 %v2883_v10  ;;  %2613 = vmatprep.mubr.msk.bf16.mxu0 %vm3269_vm1, %v3268_v1  ;;  %v2316_v10 = vld [vmem:[#allocation10 + $0x12] ss:$0 sm:$0xff] }
 0x1ed   : > { %2599 = vmatprep.subr.bf16.mxu0 %v3268_v1 }
 0x1f0   : > { %2600 = vmatpush3.bf16.msra.mxu0 %v2884_v13 }
 0x1f1   : > { %2601 = vmatprep.subr.bf16.mxu0 %v3268_v1 }
 0x1f4   : > { %2602 = vmatpush3.bf16.msra.mxu0 %v2885_v14 }
 0x1f5   : > { %2603 = vmatprep.subr.bf16.mxu0 %v3268_v1 }
 0x1f8   : > { %2604 = vmatpush3.bf16.msra.mxu0 %v2886_v15 }
 0x1f9   : > { %2605 = vmatprep.subr.bf16.mxu0 %v3268_v1 }
 0x1fc   : > { %2606 = vmatpush3.bf16.msra.mxu0 %v2887_v16 }
 0x1fd   : > { %2607 = vmatprep.subr.bf16.mxu0 %v3268_v1 }
 0x200   : > { %2608 = vmatpush3.bf16.msra.mxu0 %v2888_v18 }
 0x201   : > { %2609 = vmatprep.subr.bf16.mxu0 %v3268_v1 }
 0x204   : > { %2610 = vmatpush3.bf16.msra.mxu0 %v2889_v21  ;;  %v2925_v21 = vld [vmem:[#allocation13 + $0xe8] sm:$0xff]  }
 0x205   : > { %2611 = vmatprep.subr.bf16.mxu0 %v3268_v1 }
 0x208   : > { %2612 = vmatpush3.bf16.msra.mxu0 %v2890_v25  ;;  %v2928_v25 = vld [vmem:[#allocation13 + $0xd0] sm:$0xff]  }
 0x209   : > { %2637 = vmatprep.subr.bf16.mxu0 %v3268_v1 }
 0x20b   : > { %2614 = vmatmul.mubr.bf16.vlgmr.msra.gmra.mxu0 %v1022_v28 }
 0x20c   : > { %2638 = vmatpush3.bf16.msra.mxu0 %v2891_v27  ;;  %2653 = vmatprep.mubr.msk.bf16.mxu0 %vm3269_vm1, %v3268_v1  ;;  %v2336_v27 = vld [vmem:[#allocation10 + $0x16] ss:$0 sm:$0xff] }
 0x20d   : > { %2639 = vmatprep.subr.bf16.mxu0 %v3268_v1 }
 0x210   : > { %2640 = vmatpush3.bf16.msra.mxu0 %v2892_v24  ;;  %v2930_v24 = vld [vmem:[#allocation13 + $0xc0] sm:$0xff]  }
 0x211   : > { %2641 = vmatprep.subr.bf16.mxu0 %v3268_v1 }
 0x214   : > { %2642 = vmatpush3.bf16.msra.mxu0 %v2893_v30 }
 0x215   : > { %2643 = vmatprep.subr.bf16.mxu0 %v3268_v1 }
 0x218   : > { %2644 = vmatpush3.bf16.msra.mxu0 %v2894_v31 }
 0x219   : > { %2645 = vmatprep.subr.bf16.mxu0 %v3268_v1 }
 0x21c   : > { %2646 = vmatpush3.bf16.msra.mxu0 %v2895_v32 }
 0x21d   : > { %2647 = vmatprep.subr.bf16.mxu0 %v3268_v1 }
 0x220   : > { %2648 = vmatpush3.bf16.msra.mxu0 %v2896_v33 }
 0x221   : > { %2649 = vmatprep.subr.bf16.mxu0 %v3268_v1 }
 0x224   : > { %2650 = vmatpush3.bf16.msra.mxu0 %v2897_v35  ;;  %v2279_v35 = vld [vmem:[#allocation10 + $0x3] ss:$0 sm:$0xff] }
 0x225   : > { %2651 = vmatprep.subr.bf16.mxu0 %v3268_v1 }
 0x228   : > { %2652 = vmatpush3.bf16.msra.mxu0 %v2898_v38 }
 0x229   : > { %2677 = vmatprep.subr.bf16.mxu0 %v3268_v1 }
 0x22b   : > { %2654 = vmatmul.mubr.bf16.vlgmr.msra.gmra.mxu0 %v1257_v40 }
 0x22c   : > { %2693 = vmatprep.mubr.msk.bf16.mxu0 %vm3269_vm1, %v3268_v1 }
 0x28b   : > { %v553_v42 = vpop.f32.mrf.mxu0 }
 0x28c   : > { %v554_v43 = vadd.f32 %v2270_v41, %v553_v42 }
 0x28d   : > { %v2535_v44 = vpop.f32.mrf.mxu0 }
 0x28e   : > { %v559_v45 = vmax.f32 %v554_v43, 0.0  ;;  %v2299_v43 = vld [vmem:[#allocation10 + $0x7] ss:$0 sm:$0xff] }
 0x28f   : > { %v556_v46 = vpop.f32.mrf.mxu0 }
 0x290   : > { %v576_v48 = vpack.c.bf16 %v559_v45, %v559_v45  ;;  %v2309_v45 = vld [vmem:[#allocation10 + $0x9] ss:$0 sm:$0xff] }
 0x291   : > { %v2536_v49 = vpop.f32.mrf.mxu0 }
 0x292   : > { %2554 = vmatmul.mubr.bf16.vlgmr.msra.gmra.mxu1 %v576_v48 }
 0x293   : > { %2578 = vmatpush3.bf16.msra.mxu1 %v2907_v47  ;;  %2593 = vmatprep.mubr.msk.bf16.mxu1 %vm3269_vm1, %v3268_v1 }
 0x294   : > { %2579 = vmatprep.subr.bf16.mxu1 %v3268_v1 }
 0x297   : > { %2580 = vmatpush3.bf16.msra.mxu1 %v2908_v50 }
 0x298   : > { %2581 = vmatprep.subr.bf16.mxu1 %v3268_v1 }
 0x29b   : > { %2582 = vmatpush3.bf16.msra.mxu1 %v2909_v51  ;;  %v2325_v51 = vld [vmem:[#allocation10 + $0x13] ss:$0 sm:$0xff] }
 0x29c   : > { %2583 = vmatprep.subr.bf16.mxu1 %v3268_v1 }
 0x29f   : > { %2584 = vmatpush3.bf16.msra.mxu1 %v2910_v52 }
 0x2a0   : > { %2585 = vmatprep.subr.bf16.mxu1 %v3268_v1 }
 0x2a3   : > { %2586 = vmatpush3.bf16.msra.mxu1 %v2911_v53  ;;  %v2354_v53 = vld [vmem:[#allocation10 + $0x18] ss:$0 sm:$0xff] }
 0x2a4   : > { %2587 = vmatprep.subr.bf16.mxu1 %v3268_v1 }
 0x2a7   : > { %2588 = vmatpush3.bf16.msra.mxu1 %v2912_v54 }
 0x2a8   : > { %2589 = vmatprep.subr.bf16.mxu1 %v3268_v1 }
 0x2ab   : > { %v800_v57 = vpop.f32.mrf.mxu0  ;;  %2590 = vmatpush3.bf16.msra.mxu1 %v2913_v55 }
 0x2ac   : > { %v801_v59 = vadd.f32 %v2290_v56, %v800_v57  ;;  %2591 = vmatprep.subr.bf16.mxu1 %v3268_v1 }
 0x2ad   : > { %v2575_v60 = vpop.f32.mrf.mxu0 }
 0x2ae   : > { %v806_v61 = vmax.f32 %v801_v59, 0.0  ;;  %v2345_v59 = vld [vmem:[#allocation10 + $0x17] ss:$0 sm:$0xff] }
 0x2af   : > { %v803_v62 = vpop.f32.mrf.mxu0  ;;  %2592 = vmatpush3.bf16.msra.mxu1 %v2914_v58 }
 0x2b0   : > { %v824_v0 = vpack.c.bf16 %v806_v61, %v806_v61  ;;  %2617 = vmatprep.subr.bf16.mxu1 %v3268_v1  ;;  %v2355_v61 = vld [vmem:[#allocation10 + $0x19] ss:$0 sm:$0xff] }
 0x2b1   : > { %v2576_v2 = vpop.f32.mrf.mxu0 }
 0x2b2   : > { %2594 = vmatmul.mubr.bf16.vlgmr.msra.gmra.mxu1 %v824_v0 }
 0x2b3   : > { %2618 = vmatpush3.bf16.msra.mxu1 %v2915_v63  ;;  %2633 = vmatprep.mubr.msk.bf16.mxu1 %vm3269_vm1, %v3268_v1 }
 0x2b4   : > { %2619 = vmatprep.subr.bf16.mxu1 %v3268_v1 }
 0x2b7   : > { %2620 = vmatpush3.bf16.msra.mxu1 %v2916_v4 }
 0x2b8   : > { %2621 = vmatprep.subr.bf16.mxu1 %v3268_v1 }
 0x2bb   : > { %2622 = vmatpush3.bf16.msra.mxu1 %v2917_v5 }
 0x2bc   : > { %2623 = vmatprep.subr.bf16.mxu1 %v3268_v1 }
 0x2bf   : > { %2624 = vmatpush3.bf16.msra.mxu1 %v2918_v6  ;;  %v935_v6 = vstv %s2267_s9 }
 0x2c0   : > { %2625 = vmatprep.subr.bf16.mxu1 %v3268_v1 }
 0x2c3   : > { %2626 = vmatpush3.bf16.msra.mxu1 %v2919_v7 }
 0x2c4   : > { %2627 = vmatprep.subr.bf16.mxu1 %v3268_v1 }
 0x2c7   : > { %2628 = vmatpush3.bf16.msra.mxu1 %v2920_v8 }
 0x2c8   : > { %2629 = vmatprep.subr.bf16.mxu1 %v3268_v1 }
 0x2cb   : > { %v1110_v11 = vpop.f32.mrf.mxu0  ;;  %2630 = vmatpush3.bf16.msra.mxu1 %v2921_v9 }
 0x2cc   : > { %v1111_v13 = vadd.f32 %v2316_v10, %v1110_v11  ;;  %2631 = vmatprep.subr.bf16.mxu1 %v3268_v1 }
 0x2cd   : > { %v2615_v14 = vpop.f32.mrf.mxu0 }
 0x2ce   : > { %v1116_v15 = vmax.f32 %v1111_v13, 0.0  ;;  %v943_v13 = vstv %s422_s11 }
 0x2cf   : > { %v1113_v16 = vpop.f32.mrf.mxu0  ;;  %2632 = vmatpush3.bf16.msra.mxu1 %v2922_v12 }
 0x2d0   : > { %v1134_v18 = vpack.c.bf16 %v1116_v15, %v1116_v15  ;;  %2657 = vmatprep.subr.bf16.mxu1 %v3268_v1 }
 0x2d1   : > { %v2616_v19 = vpop.f32.mrf.mxu0 }
 0x2d2   : > { %2634 = vmatmul.mubr.bf16.vlgmr.msra.gmra.mxu1 %v1134_v18 }
 0x2d3   : > { %2658 = vmatpush3.bf16.msra.mxu1 %v2923_v17  ;;  %2673 = vmatprep.mubr.msk.bf16.mxu1 %vm3269_vm1, %v3268_v1 }
 0x2d4   : > { %2659 = vmatprep.subr.bf16.mxu1 %v3268_v1 }
 0x2d7   : > { %2660 = vmatpush3.bf16.msra.mxu1 %v2924_v20 }
 0x2d8   : > { %2661 = vmatprep.subr.bf16.mxu1 %v3268_v1 }
 0x2db   : > { %2662 = vmatpush3.bf16.msra.mxu1 %v2925_v21 }
 0x2dc   : > { %2663 = vmatprep.subr.bf16.mxu1 %v3268_v1 }
 0x2df   : > { %2664 = vmatpush3.bf16.msra.mxu1 %v2926_v22 }
 0x2e0   : > { %2665 = vmatprep.subr.bf16.mxu1 %v3268_v1 }
 0x2e3   : > { %2666 = vmatpush3.bf16.msra.mxu1 %v2927_v23 }
 0x2e4   : > { %2667 = vmatprep.subr.bf16.mxu1 %v3268_v1 }
 0x2e7   : > { %2668 = vmatpush3.bf16.msra.mxu1 %v2928_v25  ;;  %v1480_v25 = vstv %s2313_s23 }
 0x2e8   : > { %2669 = vmatprep.subr.bf16.mxu1 %v3268_v1 }
 0x2eb   : > { %v1345_v28 = vpop.f32.mrf.mxu0  ;;  %2670 = vmatpush3.bf16.msra.mxu1 %v2929_v26 }
 0x2ec   : > { %v1346_v29 = vadd.f32 %v2336_v27, %v1345_v28  ;;  %2671 = vmatprep.subr.bf16.mxu1 %v3268_v1 }
 0x2ed   : > { %v2655_v30 = vpop.f32.mrf.mxu0 }
 0x2ee   : > { %v1351_v31 = vmax.f32 %v1346_v29, 0.0 }
 0x2ef   : > { %v1348_v32 = vpop.f32.mrf.mxu0  ;;  %2672 = vmatpush3.bf16.msra.mxu1 %v2930_v24 }
 0x2f0   : > { %v1369_v33 = vpack.c.bf16 %v1351_v31, %v1351_v31  ;;  %2697 = vmatprep.subr.bf16.mxu1 %v3268_v1  ;;  %v1488_v31 = vstv %s977_s8 }
 0x2f1   : > { %v2656_v34 = vpop.f32.mrf.mxu0 }
 0x2f2   : > { %2674 = vmatmul.mubr.bf16.vlgmr.msra.gmra.mxu1 %v1369_v33 }
 0x2f3   : > { %2713 = vmatprep.mubr.msk.bf16.mxu1 %vm3269_vm1, %v3268_v1 }
 0x352   : > { %v664_v36 = vpop.f32.mrf.mxu1 }
 0x353   : > { %v665_v38 = vadd.f32 %v2279_v35, %v664_v36 }
 0x354   : > { %v2555_v39 = vpop.f32.mrf.mxu1 }
 0x355   : > { %v923_v40 = vmul.f32 %v2308_v37, %v665_v38 }
 0x356   : > { %v667_v41 = vpop.f32.mrf.mxu1 }
 0x357   : > { %924 = vadd.xlane.f32.xlu0 %v923_v40 }
 0x358   : > { %v2556_v42 = vpop.f32.mrf.mxu1 }
 0x372   : > { %v912_v44 = vpop.f32.mrf.mxu1 }
 0x373   : > { %v913_v46 = vadd.f32 %v2299_v43, %v912_v44 }
 0x374   : > { %v2595_v47 = vpop.f32.mrf.mxu1 }
 0x375   : > { %v931_v48 = vmul.f32 %v2309_v45, %v913_v46 }
 0x376   : > { %v915_v49 = vpop.f32.mrf.mxu1 }
 0x377   : > { %932 = vadd.xlane.f32.xlu1 %v931_v48 }
 0x378   : > { %v2596_v50 = vpop.f32.mrf.mxu1 }
 0x392   : > { %v1222_v52 = vpop.f32.mrf.mxu1 }
 0x393   : > { %v1223_v54 = vadd.f32 %v2325_v51, %v1222_v52 }
 0x394   : > { %v2635_v55 = vpop.f32.mrf.mxu1 }
 0x395   : > { %v1468_v56 = vmul.f32 %v2354_v53, %v1223_v54  ;;  %v2311_v55 = vld [vmem:[#allocation10 + $0xa] ss:$0 sm:$0xff] }
 0x396   : > { %v1225_v57 = vpop.f32.mrf.mxu1 }
 0x397   : > { %1469 = vadd.xlane.f32.xlu0 %v1468_v56  ;;  %v2312_v57 = vld [vmem:[#allocation10 + $0xb] ss:$0 sm:$0xff] }
 0x398   : > { %v2636_v58 = vpop.f32.mrf.mxu1 }
 0x3b2   : > { %v1457_v60 = vpop.f32.mrf.mxu1 }
 0x3b3   : > { %v1458_v62 = vadd.f32 %v2345_v59, %v1457_v60 }
 0x3b4   : > { %v2675_v63 = vpop.f32.mrf.mxu1 }
 0x3b5   : > { %v1476_v0 = vmul.f32 %v2355_v61, %v1458_v62 }
 0x3b6   : > { %v1460_v2 = vpop.f32.mrf.mxu1 }
 0x3b7   : > { %1477 = vadd.xlane.f32.xlu1 %v1476_v0  ;;  %v2357_v2 = vld [vmem:[#allocation10 + $0x1a] ss:$0 sm:$0xff] }
 0x3b8   : > { %v2676_v4 = vpop.f32.mrf.mxu1 }
 0x3e0   : > { %v925_v5 = vpop.xlane.xlu0 %924 }
 0x400   : > { %v933_v7 = vpop.xlane.xlu1 %932 }
 0x401   : > { %v934_v8 = vadd.f32 %v933_v7, %v925_v5  ;;  %v2358_v5 = vld [vmem:[#allocation10 + $0x1b] ss:$0 sm:$0xff] }
 0x403   : > { %v936_v9 = vadd.f32 %v935_v6, %v934_v8 }
 0x405   : > { %v2310_v10 = vmul.f32 -1.442695, %v936_v9  ;;  %v2931_v9 = vld [vmem:[#allocation12 + $0x138] sm:$0xff]  }
 0x406   : > { %2678 = vmatpush3.bf16.msra.mxu0 %v2931_v9 }
 0x407   : > { %2969 = vpow2.f32 %v2310_v10  ;;  %v2932_v10 = vld [vmem:[#allocation12 + $0x130] sm:$0xff]   ;;  %2679 = vmatprep.subr.bf16.mxu0 %v3268_v1 }
 0x40a   : > { %2680 = vmatpush3.bf16.msra.mxu0 %v2932_v10  ;;  %v2956_v10 = vld [vmem:[#allocation13 + $0x170] sm:$0xff]  }
 0x40b   : > { %2681 = vmatprep.subr.bf16.mxu0 %v3268_v1 }
 0x414   : > { %v2970_v11 = vpop.eup %2969 }
 0x415   : > { %v940_v12 = vadd.f32 1.0, %v2970_v11 }
 0x417   : > { %2971 = vrcp.f32 %v940_v12 }
 0x420   : > { %v1470_v23 = vpop.xlane.xlu0 %1469 }
 0x424   : > { %v2972_v14 = vpop.eup %2971 }
 0x425   : > { %v944_v15 = vmul.f32 %v2972_v14, %v943_v13 }
 0x427   : > { %v945_v16 = vmax.f32 %v944_v15, 0.15 }
 0x429   : > { %v946_v17 = vmin.f32 %v945_v16, 0.85  ;;  %v2933_v16 = vld [vmem:[#allocation12 + $0x128] sm:$0xff]  }
 0x42a   : > { %2682 = vmatpush3.bf16.msra.mxu0 %v2933_v16  ;;  %v2962_v16 = vld [vmem:[#allocation13 + $0x140] sm:$0xff]  }
 0x42b   : > { %v948_v18 = vsub.f32 1.0, %v946_v17  ;;  %v947_v19 = vmul.f32 %v946_v17, %v665_v38  ;;  %2683 = vmatprep.subr.bf16.mxu0 %v3268_v1  ;;  %v2934_v17 = vld [vmem:[#allocation12 + $0x120] sm:$0xff]  }
 0x42d   : > { %v949_v20 = vmul.f32 %v948_v18, %v913_v46  ;;  %v2935_v18 = vld [vmem:[#allocation12 + $0x118] sm:$0xff]  }
 0x42e   : > { %2684 = vmatpush3.bf16.msra.mxu0 %v2934_v17  ;;  %v2382_v17 = vld [vmem:[#allocation10 + $0x26] ss:$0 sm:$0xff] }
 0x42f   : > { %v950_v21 = vadd.f32 %v949_v20, %v947_v19  ;;  %2685 = vmatprep.subr.bf16.mxu0 %v3268_v1  ;;  %v2936_v19 = vld [vmem:[#allocation12 + $0x110] sm:$0xff]   ;;  %v2937_v20 = vld [vmem:[#allocation12 + $0x108] sm:$0xff]  }
 0x431   : > { %v953_v22 = vmul.f32 %v3500_v3, %v950_v21 }
 0x432   : > { %2686 = vmatpush3.bf16.msra.mxu0 %v2935_v18 }
 0x433   : > { %954 = vadd.xlane.f32.xlu0 %v953_v22  ;;  %2687 = vmatprep.subr.bf16.mxu0 %v3268_v1 }
 0x436   : > { %2688 = vmatpush3.bf16.msra.mxu0 %v2936_v19 }
 0x437   : > { %2689 = vmatprep.subr.bf16.mxu0 %v3268_v1 }
 0x43a   : > { %2690 = vmatpush3.bf16.msra.mxu0 %v2937_v20 }
 0x43b   : > { %2691 = vmatprep.subr.bf16.mxu0 %v3268_v1 }
 0x440   : > { %v1478_v26 = vpop.xlane.xlu1 %1477 }
 0x441   : > { %v1479_v27 = vadd.f32 %v1478_v26, %v1470_v23 }
 0x443   : > { %v1481_v28 = vadd.f32 %v1480_v25, %v1479_v27 }
 0x445   : > { %v2356_v24 = vmul.f32 -1.442695, %v1481_v28  ;;  %v2947_v28 = vld [vmem:[#allocation13 + $0x138] sm:$0xff]  }
 0x446   : > { %2698 = vmatpush3.bf16.msra.mxu1 %v2947_v28  ;;  %v2400_v28 = vld [vmem:[#allocation10 + $0x28] ss:$0 sm:$0xff] }
 0x447   : > { %2973 = vpow2.f32 %v2356_v24  ;;  %v2948_v24 = vld [vmem:[#allocation13 + $0x130] sm:$0xff]   ;;  %2699 = vmatprep.subr.bf16.mxu1 %v3268_v1 }
 0x44a   : > { %2700 = vmatpush3.bf16.msra.mxu1 %v2948_v24 }
 0x44b   : > { %2701 = vmatprep.subr.bf16.mxu1 %v3268_v1 }
 0x454   : > { %v2974_v29 = vpop.eup %2973 }
 0x455   : > { %v1485_v30 = vadd.f32 1.0, %v2974_v29  ;;  %v2949_v29 = vld [vmem:[#allocation13 + $0x128] sm:$0xff]  }
 0x456   : > { %2702 = vmatpush3.bf16.msra.mxu1 %v2949_v29 }
 0x457   : > { %2975 = vrcp.f32 %v1485_v30  ;;  %v2950_v30 = vld [vmem:[#allocation13 + $0x120] sm:$0xff]   ;;  %2703 = vmatprep.subr.bf16.mxu1 %v3268_v1 }
 0x45a   : > { %2704 = vmatpush3.bf16.msra.mxu1 %v2950_v30 }
 0x45b   : > { %2705 = vmatprep.subr.bf16.mxu1 %v3268_v1 }
 0x464   : > { %v2976_v32 = vpop.eup %2975 }
 0x465   : > { %v1489_v33 = vmul.f32 %v2976_v32, %v1488_v31  ;;  %v2951_v31 = vld [vmem:[#allocation13 + $0x118] sm:$0xff]   ;;  %v2952_v32 = vld [vmem:[#allocation13 + $0x110] sm:$0xff]  }
 0x466   : > { %2706 = vmatpush3.bf16.msra.mxu1 %v2951_v31 }
 0x467   : > { %v1490_v34 = vmax.f32 %v1489_v33, 0.15  ;;  %2707 = vmatprep.subr.bf16.mxu1 %v3268_v1 }
 0x469   : > { %v1491_v35 = vmin.f32 %v1490_v34, 0.85 }
 0x46a   : > { %2708 = vmatpush3.bf16.msra.mxu1 %v2952_v32 }
 0x46b   : > { %v1493_v36 = vsub.f32 1.0, %v1491_v35  ;;  %v1492_v37 = vmul.f32 %v1491_v35, %v1223_v54  ;;  %2709 = vmatprep.subr.bf16.mxu1 %v3268_v1 }
 0x46d   : > { %v1494_v38 = vmul.f32 %v1493_v36, %v1458_v62 }
 0x46f   : > { %v1495_v39 = vadd.f32 %v1494_v38, %v1492_v37  ;;  %v2360_v37 = vld [vmem:[#allocation10 + $0x20] ss:$0 sm:$0xff] }
 0x471   : > { %v1498_v40 = vmul.f32 %v3500_v3, %v1495_v39 }
 0x473   : > { %1499 = vadd.xlane.f32.xlu1 %v1498_v40 }
 0x4bc   : > { %v955_v41 = vpop.xlane.xlu0 %954 }
 0x4bd   : > { %v956_v42 = vmul.f32 0.03125, %v955_v41 }
 0x4bf   : > { %v957_v43 = vsub.f32 %v950_v21, %v956_v42  ;;  %v2938_v21 = vld [vmem:[#allocation12 + $0x100] sm:$0xff]   ;;  %v2939_v42 = vld [vmem:[#allocation12 + $0x178] sm:$0xff]  }
 0x4c0   : > { %2692 = vmatpush3.bf16.msra.mxu0 %v2938_v21 }
 0x4c1   : > { %v958_v44 = vmul.f32 %v3500_v3, %v957_v43  ;;  %2717 = vmatprep.subr.bf16.mxu0 %v3268_v1 }
 0x4c3   : > { %v959_v45 = vmul.f32 %v958_v44, %v958_v44 }
 0x4c5   : > { %960 = vadd.xlane.f32.xlu0 %v959_v45  ;;  %v2941_v45 = vld [vmem:[#allocation12 + $0x168] sm:$0xff]  }
 0x4fc   : > { %v1500_v46 = vpop.xlane.xlu1 %1499 }
 0x4fd   : > { %v1501_v47 = vmul.f32 0.03125, %v1500_v46  ;;  %v2942_v46 = vld [vmem:[#allocation12 + $0x160] sm:$0xff]  }
 0x4ff   : > { %v1502_v48 = vsub.f32 %v1495_v39, %v1501_v47  ;;  %v2361_v39 = vld [vmem:[#allocation10 + $0x21] ss:$0 sm:$0xff]  ;;  %v2943_v47 = vld [vmem:[#allocation12 + $0x158] sm:$0xff]  }
 0x501   : > { %v1503_v49 = vmul.f32 %v3500_v3, %v1502_v48  ;;  %v2944_v48 = vld [vmem:[#allocation12 + $0x150] sm:$0xff]  }
 0x503   : > { %v1504_v50 = vmul.f32 %v1503_v49, %v1503_v49 }
 0x505   : > { %1505 = vadd.xlane.f32.xlu1 %v1504_v50  ;;  %v2946_v50 = vld [vmem:[#allocation12 + $0x140] sm:$0xff]  }
 0x54e   : > { %v961_v51 = vpop.xlane.xlu0 %960 }
 0x54f   : > { %v962_v52 = vmul.f32 0.03125, %v961_v51 }
 0x551   : > { %v963_v53 = vadd.f32 1e-05, %v962_v52 }
 0x553   : > { %2977 = vrsqrt.f32 %v963_v53 }
 0x560   : > { %v2978_v54 = vpop.eup %2977 }
 0x561   : > { %v965_v56 = vmul.f32 %v2978_v54, %v958_v44  ;;  %v2940_v44 = vld [vmem:[#allocation12 + $0x170] sm:$0xff]  }
 0x563   : > { %v970_v58 = vmul.f32 %v2311_v55, %v965_v56  ;;  %v2380_v55 = vld [vmem:[#allocation10 + $0x24] ss:$0 sm:$0xff] }
 0x565   : > { %v975_v59 = vadd.f32 %v2312_v57, %v970_v58  ;;  %v2381_v57 = vld [vmem:[#allocation10 + $0x25] ss:$0 sm:$0xff] }
 0x567   : > { %v1525_v60 = vmul.f32 %v3500_v3, %v975_v59 }
 0x569   : > { %1526 = vadd.xlane.f32.xlu0 %v1525_v60 }
 0x58e   : > { %v1506_v61 = vpop.xlane.xlu1 %1505 }
 0x58f   : > { %v1507_v62 = vmul.f32 0.03125, %v1506_v61  ;;  %v2953_v61 = vld [vmem:[#allocation13 + $0x108] sm:$0xff]  }
 0x590   : > { %2710 = vmatpush3.bf16.msra.mxu1 %v2953_v61 }
 0x591   : > { %v1508_v63 = vadd.f32 1e-05, %v1507_v62  ;;  %2711 = vmatprep.subr.bf16.mxu1 %v3268_v1  ;;  %v2954_v62 = vld [vmem:[#allocation13 + $0x100] sm:$0xff]  }
 0x593   : > { %2979 = vrsqrt.f32 %v1508_v63  ;;  %v2362_v63 = vld [vmem:[#allocation10 + $0x22] ss:$0 sm:$0xff] }
 0x594   : > { %2712 = vmatpush3.bf16.msra.mxu1 %v2954_v62 }
 0x595   : > { %2737 = vmatprep.subr.bf16.mxu1 %v3268_v1 }
 0x5a0   : > { %v2980_v0 = vpop.eup %2979 }
 0x5a1   : > { %v1510_v4 = vmul.f32 %v2980_v0, %v1503_v49  ;;  %v2945_v49 = vld [vmem:[#allocation12 + $0x148] sm:$0xff]  }
 0x5a3   : > { %v1515_v6 = vmul.f32 %v2357_v2, %v1510_v4 }
 0x5a5   : > { %v1520_v7 = vadd.f32 %v2358_v5, %v1515_v6 }
 0x5a7   : > { %v1773_v8 = vmul.f32 %v3500_v3, %v1520_v7 }
 0x5a9   : > { %1774 = vadd.xlane.f32.xlu1 %v1773_v8 }
 0x5f2   : > { %v1527_v11 = vpop.xlane.xlu0 %1526 }
 0x5f3   : > { %v1528_v12 = vmul.f32 0.03125, %v1527_v11  ;;  %v2957_v11 = vld [vmem:[#allocation13 + $0x168] sm:$0xff]  }
 0x5f5   : > { %v1529_v13 = vsub.f32 %v975_v59, %v1528_v12  ;;  %v2958_v12 = vld [vmem:[#allocation13 + $0x160] sm:$0xff]  }
 0x5f7   : > { %v1530_v14 = vmul.f32 %v3500_v3, %v1529_v13  ;;  %v2959_v13 = vld [vmem:[#allocation13 + $0x158] sm:$0xff]  }
 0x5f9   : > { %v1531_v15 = vmul.f32 %v1530_v14, %v1530_v14 }
 0x5fb   : > { %1532 = vadd.xlane.f32.xlu0 %v1531_v15  ;;  %v2961_v15 = vld [vmem:[#allocation13 + $0x148] sm:$0xff]  }
 0x632   : > { %v1775_v22 = vpop.xlane.xlu1 %1774 }
 0x633   : > { %v1776_v23 = vmul.f32 0.03125, %v1775_v22 }
 0x635   : > { %v1777_v25 = vsub.f32 %v1520_v7, %v1776_v23  ;;  %v2955_v7 = vld [vmem:[#allocation13 + $0x178] sm:$0xff]  }
 0x637   : > { %v3624_v26 = vmul.f32 %v3500_v3, %v1777_v25 }
 0x639   : > { %v1779_v27 = vmul.f32 %v3624_v26, %v3624_v26 }
 0x63b   : > { %1780 = vadd.xlane.f32.xlu1 %v1779_v27 }
 0x684   : > { %v1533_v33 = vpop.xlane.xlu0 %1532 }
 0x685   : > { %v1534_v34 = vmul.f32 0.03125, %v1533_v33 }
 0x687   : > { %v1535_v35 = vadd.f32 1e-05, %v1534_v34  ;;  %v2401_v34 = vld [vmem:[#allocation10 + $0x29] ss:$0 sm:$0xff] }
 0x689   : > { %2981 = vrsqrt.f32 %v1535_v35 }
 0x696   : > { %v2982_v36 = vpop.eup %2981 }
 0x697   : > { %v1537_v38 = vmul.f32 %v2982_v36, %v1530_v14  ;;  %v2960_v14 = vld [vmem:[#allocation13 + $0x150] sm:$0xff]  }
 0x699   : > { %v1542_v40 = vmul.f32 %v2360_v37, %v1537_v38 }
 0x69b   : > { %v1547_v41 = vadd.f32 %v2361_v39, %v1542_v40 }
 0x69d   : > { %v1565_v43 = vpack.c.bf16 %v1547_v41, %v1547_v41  ;;  %v2036_v41 = vstv %s2359_s15 }
 0x69f   : > { %2694 = vmatmul.mubr.bf16.vlgmr.msra.gmra.mxu0 %v1565_v43 }
 0x6a0   : > { %2718 = vmatpush3.bf16.msra.mxu0 %v2939_v42  ;;  %2733 = vmatprep.mubr.msk.bf16.mxu0 %vm3269_vm1, %v3268_v1 }
 0x6a1   : > { %2719 = vmatprep.subr.bf16.mxu0 %v3268_v1 }
 0x6a4   : > { %2720 = vmatpush3.bf16.msra.mxu0 %v2940_v44 }
 0x6a5   : > { %2721 = vmatprep.subr.bf16.mxu0 %v3268_v1 }
 0x6a8   : > { %2722 = vmatpush3.bf16.msra.mxu0 %v2941_v45 }
 0x6a9   : > { %2723 = vmatprep.subr.bf16.mxu0 %v3268_v1 }
 0x6ac   : > { %2724 = vmatpush3.bf16.msra.mxu0 %v2942_v46 }
 0x6ad   : > { %2725 = vmatprep.subr.bf16.mxu0 %v3268_v1 }
 0x6b0   : > { %2726 = vmatpush3.bf16.msra.mxu0 %v2943_v47 }
 0x6b1   : > { %2727 = vmatprep.subr.bf16.mxu0 %v3268_v1 }
 0x6b4   : > { %2728 = vmatpush3.bf16.msra.mxu0 %v2944_v48 }
 0x6b5   : > { %2729 = vmatprep.subr.bf16.mxu0 %v3268_v1 }
 0x6b8   : > { %2730 = vmatpush3.bf16.msra.mxu0 %v2945_v49 }
 0x6b9   : > { %2731 = vmatprep.subr.bf16.mxu0 %v3268_v1 }
 0x6bc   : > { %2732 = vmatpush3.bf16.msra.mxu0 %v2946_v50 }
 0x6c4   : > { %v1781_v51 = vpop.xlane.xlu1 %1780 }
 0x6c5   : > { %v1782_v52 = vmul.f32 0.03125, %v1781_v51 }
 0x6c7   : > { %v1783_v53 = vadd.f32 1e-05, %v1782_v52 }
 0x6c9   : > { %2983 = vrsqrt.f32 %v1783_v53 }
 0x6d6   : > { %v2984_v54 = vpop.eup %2983 }
 0x6d7   : > { %v1785_v56 = vmul.f32 %v2984_v54, %v3624_v26  ;;  %v2371_v26 = vld [vmem:[#allocation10 + $0x23] ss:$0 sm:$0xff] }
 0x6d9   : > { %v1790_v58 = vmul.f32 %v2380_v55, %v1785_v56 }
 0x6db   : > { %v1795_v59 = vadd.f32 %v2381_v57, %v1790_v58 }
 0x6dd   : > { %v1813_v60 = vpack.c.bf16 %v1795_v59, %v1795_v59 }
 0x6df   : > { %2734 = vmatmul.mubr.bf16.vlgmr.msra.gmra.mxu0 %v1813_v60 }
 0x75f   : > { %v1653_v0 = vpop.f32.mrf.mxu0 }
 0x760   : > { %v1654_v2 = vadd.f32 %v2362_v63, %v1653_v0 }
 0x761   : > { %v2695_v4 = vpop.f32.mrf.mxu0 }
 0x762   : > { %v1659_v5 = vmax.f32 %v1654_v2, 0.0  ;;  %v2403_v2 = vld [vmem:[#allocation10 + $0x2a] ss:$0 sm:$0xff] }
 0x763   : > { %v1656_v6 = vpop.f32.mrf.mxu0 }
 0x764   : > { %v1677_v8 = vpack.c.bf16 %v1659_v5, %v1659_v5  ;;  %v2404_v5 = vld [vmem:[#allocation10 + $0x2b] ss:$0 sm:$0xff] }
 0x765   : > { %v2696_v9 = vpop.f32.mrf.mxu0 }
 0x766   : > { %2714 = vmatmul.mubr.bf16.vlgmr.msra.gmra.mxu1 %v1677_v8 }
 0x767   : > { %2738 = vmatpush3.bf16.msra.mxu1 %v2955_v7  ;;  %2753 = vmatprep.mubr.msk.bf16.mxu1 %vm3269_vm1, %v3268_v1 }
 0x768   : > { %2739 = vmatprep.subr.bf16.mxu1 %v3268_v1 }
 0x76b   : > { %2740 = vmatpush3.bf16.msra.mxu1 %v2956_v10 }
 0x76c   : > { %2741 = vmatprep.subr.bf16.mxu1 %v3268_v1 }
 0x76f   : > { %2742 = vmatpush3.bf16.msra.mxu1 %v2957_v11 }
 0x770   : > { %2743 = vmatprep.subr.bf16.mxu1 %v3268_v1 }
 0x773   : > { %2744 = vmatpush3.bf16.msra.mxu1 %v2958_v12 }
 0x774   : > { %2745 = vmatprep.subr.bf16.mxu1 %v3268_v1 }
 0x777   : > { %2746 = vmatpush3.bf16.msra.mxu1 %v2959_v13 }
 0x778   : > { %2747 = vmatprep.subr.bf16.mxu1 %v3268_v1 }
 0x77b   : > { %2748 = vmatpush3.bf16.msra.mxu1 %v2960_v14 }
 0x77c   : > { %2749 = vmatprep.subr.bf16.mxu1 %v3268_v1 }
 0x77f   : > { %2750 = vmatpush3.bf16.msra.mxu1 %v2961_v15 }
 0x780   : > { %2751 = vmatprep.subr.bf16.mxu1 %v3268_v1  ;;  %v2391_v1 = vld [vmem:[#allocation10 + $0x27] ss:$0 sm:$0xff] }
 0x783   : > { %2752 = vmatpush3.bf16.msra.mxu1 %v2962_v16 }
 0x79f   : > { %v1901_v18 = vpop.f32.mrf.mxu0 }
 0x7a0   : > { %v1902_v19 = vadd.f32 %v2382_v17, %v1901_v18 }
 0x7a1   : > { %v2735_v20 = vpop.f32.mrf.mxu0 }
 0x7a2   : > { %v1907_v21 = vmax.f32 %v1902_v19, 0.0 }
 0x7a3   : > { %v1904_v22 = vpop.f32.mrf.mxu0 }
 0x7a4   : > { %v1925_v23 = vpack.c.bf16 %v1907_v21, %v1907_v21 }
 0x7a5   : > { %v2736_v25 = vpop.f32.mrf.mxu0 }
 0x7a6   : > { %2754 = vmatmul.mubr.bf16.vlgmr.msra.gmra.mxu1 %v1925_v23 }
 0x826   : > { %v1765_v27 = vpop.f32.mrf.mxu1 }
 0x827   : > { %v1766_v24 = vadd.f32 %v2371_v26, %v1765_v27 }
 0x828   : > { %v2715_v29 = vpop.f32.mrf.mxu1 }
 0x829   : > { %v2024_v30 = vmul.f32 %v2400_v28, %v1766_v24 }
 0x82a   : > { %v1768_v31 = vpop.f32.mrf.mxu1 }
 0x82b   : > { %2025 = vadd.xlane.f32.xlu0 %v2024_v30 }
 0x82c   : > { %v2716_v32 = vpop.f32.mrf.mxu1 }
 0x866   : > { %v2013_v33 = vpop.f32.mrf.mxu1 }
 0x867   : > { %v2014_v35 = vadd.f32 %v2391_v1, %v2013_v33 }
 0x868   : > { %v2755_v36 = vpop.f32.mrf.mxu1 }
 0x869   : > { %v2032_v37 = vmul.f32 %v2401_v34, %v2014_v35 }
 0x86a   : > { %v2016_v38 = vpop.f32.mrf.mxu1 }
 0x86b   : > { %2033 = vadd.xlane.f32.xlu1 %v2032_v37 }
 0x86c   : > { %v2756_v39 = vpop.f32.mrf.mxu1 }
 0x8b4   : > { %v2026_v40 = vpop.xlane.xlu0 %2025 }
 0x8f4   : > { %v2034_v42 = vpop.xlane.xlu1 %2033 }
 0x8f5   : > { %v2035_v43 = vadd.f32 %v2034_v42, %v2026_v40 }
 0x8f7   : > { %v2037_v44 = vadd.f32 %v2036_v41, %v2035_v43 }
 0x8f9   : > { %v2402_v45 = vmul.f32 -1.442695, %v2037_v44 }
 0x8fb   : > { %2985 = vpow2.f32 %v2402_v45 }
 0x908   : > { %v2986_v46 = vpop.eup %2985 }
 0x909   : > { %v2041_v47 = vadd.f32 1.0, %v2986_v46 }
 0x90b   : > { %2987 = vrcp.f32 %v2041_v47 }
 0x918   : > { %v2988_v48 = vpop.eup %2987 }
 0x919   : > { %v2044_v49 = vmax.f32 %v2988_v48, 0.15 }
 0x91b   : > { %v2045_v50 = vmin.f32 %v2044_v49, 0.85 }
 0x91d   : > { %v2047_v51 = vsub.f32 1.0, %v2045_v50  ;;  %v2046_v52 = vmul.f32 %v2045_v50, %v1766_v24 }
 0x91f   : > { %v2048_v53 = vmul.f32 %v2047_v51, %v2014_v35 }
 0x921   : > { %v2049_v54 = vadd.f32 %v2048_v53, %v2046_v52 }
 0x923   : > { %v2052_v55 = vmul.f32 %v3500_v3, %v2049_v54 }
 0x925   : > { %2053 = vadd.xlane.f32.xlu0 %v2052_v55 }
 0x9ae   : > { %v2054_v56 = vpop.xlane.xlu0 %2053 }
 0x9af   : > { %v2055_v57 = vmul.f32 0.03125, %v2054_v56 }
 0x9b1   : > { %v2056_v58 = vsub.f32 %v2049_v54, %v2055_v57 }
 0x9b3   : > { %v2057_v59 = vmul.f32 %v3500_v3, %v2056_v58 }
 0x9b5   : > { %v2058_v60 = vmul.f32 %v2057_v59, %v2057_v59 }
 0x9b7   : > { %2059 = vadd.xlane.f32.xlu1 %v2058_v60 }
 0xa40   : > { %v2060_v61 = vpop.xlane.xlu1 %2059 }
 0xa41   : > { %v2061_v62 = vmul.f32 0.03125, %v2060_v61 }
 0xa43   : > { %v2062_v63 = vadd.f32 1e-05, %v2061_v62 }
 0xa45   : > { %2989 = vrsqrt.f32 %v2062_v63 }
 0xa52   : > { %v2990_v0 = vpop.eup %2989 }
 0xa53   : > { %v2064_v4 = vmul.f32 %v2990_v0, %v2057_v59 }
 0xa55   : > { %v2069_v6 = vmul.f32 %v2403_v2, %v2064_v4 }
 0xa57   : > { %v2074_v7 = vadd.f32 %v2404_v5, %v2069_v6 }
 0xa59   : > { %2075 = vst [vmem:[%s409_s4] sm:$0xff] %v2074_v7 }
 0xa5a   : > { %3174 = shalt.err (!%p3171_p13)
}
 0xa5b   : > { %s3175_s18 = scalar_lea.hbm %s2089_s16, 128  ;;  %s3179_s26 = scalar_lea.hbm %s3705_s7, 256 }
 0xa5c   : > { %p3176_p5 = scmp.ne.s32.totalorder %s2089_s16, %s3175_s18  ;;  %p3180_p1 = scmp.lt.s32.totalorder %s2089_s16, %s3705_s7 }
 0xa5d   : > { %p3181_p6 = scmp.lt.s32.totalorder %s3179_s26, %s3175_s18 }
 0xa5e   : > { %p3177_p11 = pnand %p3176_p5, %p3745_p8 }
 0xa5f   : > { %p3182_p12 = por %p3181_p6, %p3180_p1 }
 0xa60   : > { %p3178_p2 = pneg %p3177_p11 }
 0xa62   : > { %p3183_p4 = pnand %p3182_p12, %p3178_p2 }
 0xa64   : > { %3186 = shalt.err (!%p3183_p4)
}
 0xa65   : > { %2775 = dma.vmem_to_hbm [thread:$0]  (%p3745_p8), %s2092_s21, 128, %s2089_s16, %s2077_s10  }
 0xa66 PF: > { %s3746_s23 = sld [smem:[#allocation23_spill]]  ;;  %s2103_s20 = sand.u32 1, %s3235_s27  }
 0xa67   : > { %p3747_p3 = scmp.ne.s32.totalorder %s3723_s12, 0  ;;  %s2104_s8 = scalar_lea.sflag [#allocation6], %s2103_s20 }
 0xa6c   : > { %p3748_p9 = scmp.ge.s32.totalorder %s3746_s23, 2 }
 0xa6e   : > { %p2798_p0 = pnand %p3748_p9, %p3747_p3 }
 0xa70   : > { %p2799_p7 = pneg %p2798_p0 }
 0xa72   : > { %3230 = dma.done.wait (%p2799_p7), %s2104_s8, 128  }
 0xa73   : > { %3232 = vsyncadd (%p2799_p7), %s2104_s8, 4294967168  ;;  %s32_s8 = sadd.s32 1, %s3746_s23   ;;  %s3749_s15 = sld [smem:[#allocation25_spill]] }
 0xa74   : > { %p29_p10 = scmp.ge.s32.totalorder %s32_s8, 4   ;;  %s3750_s30 = sld [smem:[#allocation22_spill]] }
 0xa75   : > { %s3751_s0 = sld [smem:[#allocation24_spill]]  ;;  %s3752_s27 = smov %s3239_s28 }
 0xa76   : > { %s3753_s28 = smov %s3243_s29  ;;  %31 = sbr.rel (!%p29_p10) target bundleno = 18 (0x12), region = 137 }
 0xa79   : > { %s3754_s29 = smov %s3749_s15 }
 0xa7b   :  { %2109 = vsyncpa [#allocation5], 1 }
 0xa7c   :  { %2111 = vsyncpa [#allocation5 + $0x1], 1 }
 0xa7d   :  { %2112 = vsyncpa [#allocation8], 1 }
 0xa7e   :  { %2114 = vsyncpa [#allocation8 + $0x1], 1 }
 0xa7f   :  { %2115 = vsyncpa [#allocation11], 1 }
 0xa80   :  { %2116 = vsyncpa [#allocation14], 1 }
 0xa81   :  { %2117 = vsyncpa [#allocation6], 1 }
 0xa82   :  { %2119 = vsyncpa [#allocation6 + $0x1], 1 }

</bundles_post_ra>
